<compile_context>
chip_gen: v6e
topology: v6e:2x2x1
jax: 0.10.0
libtpu: 0.0.40
codegen_flags: <defaults>
</compile_context>

<pallas_src>
import functools

import jax
import jax.numpy as jnp
import numpy as np
from jax.experimental import pallas as pl
from jax.experimental.pallas import tpu as pltpu


# ----------------------------------------------------------------------------
# Fused kernel: upconv(+pixel shuffle) + concat + pad + (conv3x3 dil3 + BN +
# ReLU) x 2, one grid step per batch image.  All activations stay in VMEM.
#
# Layout: channel-major, padded-flat spatial.  A padded image (C, H+6, Wp) is
# stored flattened as (C, (H+6)*Wp) with row pitch Wp >= W+6.  A dilated-conv
# tap (ky, kx) is then just the contiguous slice [3*ky*Wp + 3*kx : ... + L]
# with L = H*Wp; columns x' in [W, Wp) of each row are "garbage" that is masked
# to zero before being re-stored and is sliced away from the final output.
# ----------------------------------------------------------------------------
def _up3_fused_kernel(masks_ref, u_ref, x1_ref, wup_ref, upb_ref,
                      w1_ref, s1_ref, b1_ref, w2_ref, s2_ref, b2_ref,
                      o_ref, xcat_ref, hp_ref, *, wp):
    _, cin_up, L = u_ref.shape
    c2 = x1_ref.shape[1]
    cin = xcat_ref.shape[0]
    mid = hp_ref.shape[0]
    slab = xcat_ref.shape[1]
    off0 = 3 * wp + 3                       # flat offset of the padded interior
    tail = slab - (off0 + L)

    masks = masks_ref[...]                  # (5, L): 4 parity&valid masks, valid

    # ---- ConvTranspose2d(k=2, s=2): ONE lane-dense matmul on the NN-upsampled
    #      input + parity-mask combine (replaces the dense shuffle matrix). ----
    yall = jnp.dot(wup_ref[...], u_ref[0],
                   preferred_element_type=jnp.float32)          # (4*c2, L)
    x2u = (masks[0:1] * yall[0 * c2:1 * c2]
           + masks[1:2] * yall[1 * c2:2 * c2]
           + masks[2:3] * yall[2 * c2:3 * c2]
           + masks[3:4] * yall[3 * c2:4 * c2])
    x2u = x2u + upb_ref[...] * masks[4:5]   # bias only on valid columns

    # ---- cat([x2u, x1], channel) into padded flat scratch; halos stay zero ----
    xcat_ref[:, 0:off0] = jnp.zeros((cin, off0), jnp.float32)
    xcat_ref[:, off0 + L:off0 + L + tail] = jnp.zeros((cin, tail), jnp.float32)
    xcat_ref[0:c2, off0:off0 + L] = x2u          # x1p / x2u already have zero
    xcat_ref[c2:cin, off0:off0 + L] = x1_ref[0]  # columns at x' >= W

    # ---- conv1 (3x3, dilation 3): 9 accumulated lane-dense dots (no im2col) ----
    acc1 = None
    for t in range(9):
        ky, kx = t // 3, t % 3
        off = 3 * ky * wp + 3 * kx
        part = jnp.dot(w1_ref[t], xcat_ref[:, off:off + L],
                       preferred_element_type=jnp.float32)      # (mid, L)
        acc1 = part if acc1 is None else acc1 + part
    h = jnp.maximum(acc1 * s1_ref[...] + b1_ref[...], 0.0)
    h = h * masks[4:5]                       # zero the halo/garbage columns

    # ---- mid activation stays in VMEM (padded flat), never touches HBM ----
    hp_ref[:, 0:off0] = jnp.zeros((mid, off0), jnp.float32)
    hp_ref[:, off0 + L:off0 + L + tail] = jnp.zeros((mid, tail), jnp.float32)
    hp_ref[:, off0:off0 + L] = h

    # ---- conv2 (3x3, dilation 3) + BN + ReLU; output emitted NCHW-flat ----
    acc2 = None
    for t in range(9):
        ky, kx = t // 3, t % 3
        off = 3 * ky * wp + 3 * kx
        part = jnp.dot(w2_ref[t], hp_ref[:, off:off + L],
                       preferred_element_type=jnp.float32)      # (cout, L)
        acc2 = part if acc2 is None else acc2 + part
    o_ref[0] = jnp.maximum(acc2 * s2_ref[...] + b2_ref[...], 0.0)


def _parity_masks(H, W, wp):
    """(5, H*wp) f32: rows 0..3 = (y%2, x%2) parity masks restricted to valid
    columns (x < W), row 4 = valid-column mask."""
    p = np.arange(H * wp)
    y, x = p // wp, p % wp
    valid = x < W
    m = np.zeros((5, H * wp), np.float32)
    for d, (di, dj) in enumerate(((0, 0), (0, 1), (1, 0), (1, 1))):
        m[d] = ((y % 2 == di) & (x % 2 == dj) & valid).astype(np.float32)
    m[4] = valid.astype(np.float32)
    return jnp.asarray(m)


def up3_pallas(masks, u, x1p, wup_all, upb, w1k, s1, b1, w2k, s2, b2, *, wp):
    n, cin_up, L = u.shape
    c2 = x1p.shape[1]
    cin = 2 * c2
    mid = w1k.shape[1]
    cout = w2k.shape[1]
    H = L // wp
    slab = (H + 6) * wp + 8        # +8 slack so the last tap slice stays in-bounds

    kernel = functools.partial(_up3_fused_kernel, wp=wp)
    return pl.pallas_call(
        kernel,
        out_shape=jax.ShapeDtypeStruct((n, cout, L), jnp.float32),
        grid=(n,),
        in_specs=[
            pl.BlockSpec((5, L), lambda i: (0, 0)),                  # parity masks
            pl.BlockSpec((1, cin_up, L), lambda i: (i, 0, 0)),       # upsampled x2
            pl.BlockSpec((1, c2, L), lambda i: (i, 0, 0)),           # x1 (skip), padded rows
            pl.BlockSpec((4 * c2, cin_up), lambda i: (0, 0)),        # upconv W (all subpixels)
            pl.BlockSpec((c2, 1), lambda i: (0, 0)),                 # upconv bias
            pl.BlockSpec((9, mid, cin), lambda i: (0, 0, 0)),        # conv1 W per tap
            pl.BlockSpec((mid, 1), lambda i: (0, 0)),                # bn1 scale
            pl.BlockSpec((mid, 1), lambda i: (0, 0)),                # bn1 shift
            pl.BlockSpec((9, cout, mid), lambda i: (0, 0, 0)),       # conv2 W per tap
            pl.BlockSpec((cout, 1), lambda i: (0, 0)),               # bn2 scale
            pl.BlockSpec((cout, 1), lambda i: (0, 0)),               # bn2 shift
        ],
        out_specs=pl.BlockSpec((1, cout, L), lambda i: (i, 0, 0)),
        scratch_shapes=[
            pltpu.VMEM((cin, slab), jnp.float32),   # padded flat cat([x2u, x1])
            pltpu.VMEM((mid, slab), jnp.float32),   # padded flat mid activation
        ],
        compiler_params=pltpu.CompilerParams(dimension_semantics=("parallel",)),
    )(masks, u, x1p, wup_all, upb, w1k, s1, b1, w2k, s2, b2)


# ----------------------------------------------------------------------------
# Parameters (PyTorch layouts) with BatchNorm folded to inference scale/shift.
# ----------------------------------------------------------------------------
def make_params(key, in_channels, out_channels):
    c2 = in_channels // 2
    mid = out_channels            # DoubleConv3 with mid_channels=None -> mid = out
    ks = jax.random.split(key, 12)
    eps = 1e-5

    up_w = 0.1 * jax.random.normal(ks[0], (in_channels, c2, 2, 2), jnp.float32)
    up_b = 0.1 * jax.random.normal(ks[1], (c2,), jnp.float32)

    def conv_bn(kw, kg, kb, km, kv, cin, cout):
        w = 0.1 * jax.random.normal(kw, (cout, cin, 3, 3), jnp.float32)   # OIHW
        gamma = 1.0 + 0.1 * jax.random.normal(kg, (cout,), jnp.float32)
        beta = 0.1 * jax.random.normal(kb, (cout,), jnp.float32)
        rmean = 0.1 * jax.random.normal(km, (cout,), jnp.float32)
        rvar = 0.5 + jnp.abs(jax.random.normal(kv, (cout,), jnp.float32))
        scale = gamma / jnp.sqrt(rvar + eps)
        shift = beta - rmean * scale
        return w, scale, shift

    w1, s1, b1 = conv_bn(ks[2], ks[3], ks[4], ks[5], ks[6], in_channels, mid)
    w2, s2, b2 = conv_bn(ks[7], ks[8], ks[9], ks[10], ks[11], mid, out_channels)
    return dict(up_w=up_w, up_b=up_b, w1=w1, s1=s1, b1=b1, w2=w2, s2=s2, b2=b2)


def up3_forward(params, x1_nchw, x2_nchw):
    x1 = x1_nchw.astype(jnp.float32)
    x2 = x2_nchw.astype(jnp.float32)
    n, cin_up, hh, wh = x2.shape
    _, c2, H, W = x1.shape
    mid = params["w1"].shape[0]
    cout = params["w2"].shape[0]

    wp = ((W + 6 + 7) // 8) * 8     # padded row pitch (>= W+6, 8-aligned)
    L = H * wp

    # Wrapper-side layout plumbing (cheap XLA pads/reshapes, no compute):
    # nearest-neighbour upsample of x2, right-pad rows of x1/x2 to the pitch.
    u = jnp.repeat(jnp.repeat(x2, 2, axis=2), 2, axis=3)            # (n, Cin, H, W)
    u = jnp.pad(u, ((0, 0), (0, 0), (0, 0), (0, wp - W))).reshape(n, cin_up, L)
    x1p = jnp.pad(x1, ((0, 0), (0, 0), (0, 0), (0, wp - W))).reshape(n, c2, L)
    masks = _parity_masks(H, W, wp)

    # Kernel-side parameter layouts (computed once at trace time).
    wup_all = jnp.transpose(params["up_w"], (2, 3, 1, 0)).reshape(4 * c2, cin_up)
    upb = params["up_b"].reshape(c2, 1)
    w1k = jnp.transpose(params["w1"], (2, 3, 0, 1)).reshape(9, mid, cin_up)
    w2k = jnp.transpose(params["w2"], (2, 3, 0, 1)).reshape(9, cout, mid)
    s1, b1 = params["s1"].reshape(mid, 1), params["b1"].reshape(mid, 1)
    s2, b2 = params["s2"].reshape(cout, 1), params["b2"].reshape(cout, 1)

    y = up3_pallas(masks, u, x1p, wup_all, upb, w1k, s1, b1, w2k, s2, b2, wp=wp)
    # Output is already NCHW-flat; drop the garbage pitch columns.
    return y.reshape(n, cout, H, wp)[:, :, :, :W]
    # TODO(synk): DropBlock(7, 0.9) has no provided definition; identity (eval mode).


# ----------------------------------------------------------------------------
# Pure-JAX reference (XLA convs) for validation.
# ----------------------------------------------------------------------------
def up3_reference(params, x1_nchw, x2_nchw):
    x1 = jnp.transpose(x1_nchw, (0, 2, 3, 1)).astype(jnp.float32)
    x2 = jnp.transpose(x2_nchw, (0, 2, 3, 1)).astype(jnp.float32)
    n, hh, wh, cin = x2.shape
    c2 = cin // 2
    # transposed conv (k=2, s=2): per-subpixel einsum + interleave
    w_flat = jnp.transpose(params["up_w"], (0, 2, 3, 1)).reshape(cin, 4 * c2)
    b_flat = jnp.tile(params["up_b"], 4)
    y = jnp.einsum("nhwc,cd->nhwd", x2, w_flat) + b_flat
    y = y.reshape(n, hh, wh, 2, 2, c2).transpose(0, 1, 3, 2, 4, 5)
    y = y.reshape(n, 2 * hh, 2 * wh, c2)
    x = jnp.concatenate([y, x1], axis=-1)

    def block(x, w_oihw, scale, shift):
        w_hwio = jnp.transpose(w_oihw, (2, 3, 1, 0))
        o = jax.lax.conv_general_dilated(
            x, w_hwio, window_strides=(1, 1), padding=((3, 3), (3, 3)),
            rhs_dilation=(3, 3), dimension_numbers=("NHWC", "HWIO", "NHWC"))
        return jnp.maximum(o * scale + shift, 0.0)

    hmid = block(x, params["w1"], params["s1"], params["b1"])
    out = block(hmid, params["w2"], params["s2"], params["b2"])
    return jnp.transpose(out, (0, 3, 1, 2))


if __name__ == "__main__":
    key = jax.random.PRNGKey(0)
    k_p, k1, k2 = jax.random.split(key, 3)

    in_channels, out_channels = 8, 4
    N, H, W = 2, 16, 16
    # x1: skip connection (N, in_channels//2, H, W); x2: deep feature (N, in_channels, H/2, W/2)
    x1 = jax.random.normal(k1, (N, in_channels // 2, H, W), jnp.float32)
    x2 = jax.random.normal(k2, (N, in_channels, H // 2, W // 2), jnp.float32)

    params = make_params(k_p, in_channels, out_channels)

    out = jax.block_until_ready(up3_forward(params, x1, x2))
    ref = jax.block_until_ready(up3_reference(params, x1, x2))

    assert out.shape == (N, out_channels, H, W), out.shape
    np.testing.assert_allclose(np.asarray(out), np.asarray(ref), rtol=1e-3, atol=1e-3)
    print("KERNEL_OK")
</pallas_src>

<mosaic_0001>
module attributes {stable_mosaic.version = 11 : i64} {
  func.func @_up3_fused_kernel(%arg0: i32, %arg1: memref<5x384xf32, #tpu.memory_space<vmem>>, %arg2: memref<1x8x384xf32, #tpu.memory_space<vmem>>, %arg3: memref<1x4x384xf32, #tpu.memory_space<vmem>>, %arg4: memref<16x8xf32, #tpu.memory_space<vmem>>, %arg5: memref<4x1xf32, #tpu.memory_space<vmem>>, %arg6: memref<9x4x8xf32, #tpu.memory_space<vmem>>, %arg7: memref<4x1xf32, #tpu.memory_space<vmem>>, %arg8: memref<4x1xf32, #tpu.memory_space<vmem>>, %arg9: memref<9x4x4xf32, #tpu.memory_space<vmem>>, %arg10: memref<4x1xf32, #tpu.memory_space<vmem>>, %arg11: memref<4x1xf32, #tpu.memory_space<vmem>>, %arg12: memref<1x4x384xf32, #tpu.memory_space<vmem>>, %arg13: memref<8x536xf32, #tpu.memory_space<vmem>>, %arg14: memref<4x536xf32, #tpu.memory_space<vmem>>) attributes {dimension_semantics = [#tpu.dimension_semantics<parallel>], iteration_bounds = array<i64: 2>, scalar_prefetch = 0 : i64, scratch_operands = 2 : i64, tpu.core_type = #tpu.core_type<tc>, window_params = [{pipeline_mode = #tpu.pipeline_mode<synchronous>, transform_indices = @transform_0, window_bounds = array<i64: 5, 384>}, {transform_indices = @transform_1, window_bounds = array<i64: 1, 8, 384>}, {transform_indices = @transform_2, window_bounds = array<i64: 1, 4, 384>}, {pipeline_mode = #tpu.pipeline_mode<synchronous>, transform_indices = @transform_3, window_bounds = array<i64: 16, 8>}, {pipeline_mode = #tpu.pipeline_mode<synchronous>, transform_indices = @transform_4, window_bounds = array<i64: 4, 1>}, {pipeline_mode = #tpu.pipeline_mode<synchronous>, transform_indices = @transform_5, window_bounds = array<i64: 9, 4, 8>}, {pipeline_mode = #tpu.pipeline_mode<synchronous>, transform_indices = @transform_6, window_bounds = array<i64: 4, 1>}, {pipeline_mode = #tpu.pipeline_mode<synchronous>, transform_indices = @transform_7, window_bounds = array<i64: 4, 1>}, {pipeline_mode = #tpu.pipeline_mode<synchronous>, transform_indices = @transform_8, window_bounds = array<i64: 9, 4, 4>}, {pipeline_mode = #tpu.pipeline_mode<synchronous>, transform_indices = @transform_9, window_bounds = array<i64: 4, 1>}, {pipeline_mode = #tpu.pipeline_mode<synchronous>, transform_indices = @transform_10, window_bounds = array<i64: 4, 1>}, {transform_indices = @transform_11, window_bounds = array<i64: 1, 4, 384>}]} {
    %c0 = arith.constant 0 : index
    %c0_0 = arith.constant 0 : index
    %0 = vector.load %arg1[%c0, %c0_0] : memref<5x384xf32, #tpu.memory_space<vmem>>, vector<5x384xf32>
    %c0_1 = arith.constant 0 : index
    %c0_2 = arith.constant 0 : index
    %1 = vector.load %arg4[%c0_1, %c0_2] : memref<16x8xf32, #tpu.memory_space<vmem>>, vector<16x8xf32>
    %c0_3 = arith.constant 0 : index
    %c0_4 = arith.constant 0 : index
    %c0_5 = arith.constant 0 : index
    %2 = vector.load %arg2[%c0_3, %c0_4, %c0_5] : memref<1x8x384xf32, #tpu.memory_space<vmem>>, vector<1x8x384xf32>
    %3 = vector.shape_cast %2 : vector<1x8x384xf32> to vector<8x384xf32>
    %cst = arith.constant dense<0.000000e+00> : vector<16x384xf32>
    %4 = tpu.matmul %1, %3, %cst {dimension_numbers = #tpu.dot_dimension_numbers<[1], [0], [0], [1], [0, 0, 1, 1], [], []>} : vector<16x8xf32>, vector<8x384xf32>, vector<16x384xf32> -> vector<16x384xf32>
    %5 = vector.extract_strided_slice %0 {offsets = [0, 0], sizes = [1, 384], strides = [1, 1]} : vector<5x384xf32> to vector<1x384xf32>
    %6 = vector.extract_strided_slice %4 {offsets = [0, 0], sizes = [4, 384], strides = [1, 1]} : vector<16x384xf32> to vector<4x384xf32>
    %7 = vector.broadcast %5 : vector<1x384xf32> to vector<4x384xf32>
    %8 = arith.mulf %7, %6 : vector<4x384xf32>
    %9 = vector.extract_strided_slice %0 {offsets = [1, 0], sizes = [1, 384], strides = [1, 1]} : vector<5x384xf32> to vector<1x384xf32>
    %10 = vector.extract_strided_slice %4 {offsets = [4, 0], sizes = [4, 384], strides = [1, 1]} : vector<16x384xf32> to vector<4x384xf32>
    %11 = vector.broadcast %9 : vector<1x384xf32> to vector<4x384xf32>
    %12 = arith.mulf %11, %10 : vector<4x384xf32>
    %13 = arith.addf %8, %12 : vector<4x384xf32>
    %14 = vector.extract_strided_slice %0 {offsets = [2, 0], sizes = [1, 384], strides = [1, 1]} : vector<5x384xf32> to vector<1x384xf32>
    %15 = vector.extract_strided_slice %4 {offsets = [8, 0], sizes = [4, 384], strides = [1, 1]} : vector<16x384xf32> to vector<4x384xf32>
    %16 = vector.broadcast %14 : vector<1x384xf32> to vector<4x384xf32>
    %17 = arith.mulf %16, %15 : vector<4x384xf32>
    %18 = arith.addf %13, %17 : vector<4x384xf32>
    %19 = vector.extract_strided_slice %0 {offsets = [3, 0], sizes = [1, 384], strides = [1, 1]} : vector<5x384xf32> to vector<1x384xf32>
    %20 = vector.extract_strided_slice %4 {offsets = [12, 0], sizes = [4, 384], strides = [1, 1]} : vector<16x384xf32> to vector<4x384xf32>
    %21 = vector.broadcast %19 : vector<1x384xf32> to vector<4x384xf32>
    %22 = arith.mulf %21, %20 : vector<4x384xf32>
    %23 = arith.addf %18, %22 : vector<4x384xf32>
    %c0_6 = arith.constant 0 : index
    %c0_7 = arith.constant 0 : index
    %24 = vector.load %arg5[%c0_6, %c0_7] : memref<4x1xf32, #tpu.memory_space<vmem>>, vector<4x1xf32>
    %25 = vector.extract_strided_slice %0 {offsets = [4, 0], sizes = [1, 384], strides = [1, 1]} : vector<5x384xf32> to vector<1x384xf32>
    %26 = vector.broadcast %24 : vector<4x1xf32> to vector<4x384xf32>
    %27 = vector.broadcast %25 : vector<1x384xf32> to vector<4x384xf32>
    %28 = arith.mulf %26, %27 : vector<4x384xf32>
    %29 = arith.addf %23, %28 : vector<4x384xf32>
    %cst_8 = arith.constant 0.000000e+00 : f32
    %30 = vector.broadcast %cst_8 : f32 to vector<8x75xf32>
    %c0_9 = arith.constant 0 : index
    %c0_10 = arith.constant 0 : index
    %31 = vector.load %arg13[%c0_9, %c0_10] : memref<8x536xf32, #tpu.memory_space<vmem>>, vector<8x75xf32>
    tpu.vector_store %arg13[%c0_9, %c0_10], %30 {strides = array<i32>} : memref<8x536xf32, #tpu.memory_space<vmem>>, vector<8x75xf32>,
    %cst_11 = arith.constant 0.000000e+00 : f32
    %32 = vector.broadcast %cst_11 : f32 to vector<8x77xf32>
    %c0_12 = arith.constant 0 : index
    %c459 = arith.constant 459 : index
    %33 = vector.load %arg13[%c0_12, %c459] : memref<8x536xf32, #tpu.memory_space<vmem>>, vector<8x77xf32>
    tpu.vector_store %arg13[%c0_12, %c459], %32 {strides = array<i32>} : memref<8x536xf32, #tpu.memory_space<vmem>>, vector<8x77xf32>,
    %c0_13 = arith.constant 0 : index
    %c75 = arith.constant 75 : index
    %34 = vector.load %arg13[%c0_13, %c75] : memref<8x536xf32, #tpu.memory_space<vmem>>, vector<4x384xf32>
    tpu.vector_store %arg13[%c0_13, %c75], %29 {strides = array<i32>} : memref<8x536xf32, #tpu.memory_space<vmem>>, vector<4x384xf32>,
    %c0_14 = arith.constant 0 : index
    %c0_15 = arith.constant 0 : index
    %c0_16 = arith.constant 0 : index
    %35 = vector.load %arg3[%c0_14, %c0_15, %c0_16] : memref<1x4x384xf32, #tpu.memory_space<vmem>>, vector<1x4x384xf32>
    %36 = vector.shape_cast %35 : vector<1x4x384xf32> to vector<4x384xf32>
    %c4 = arith.constant 4 : index
    %c75_17 = arith.constant 75 : index
    %37 = vector.load %arg13[%c4, %c75_17] : memref<8x536xf32, #tpu.memory_space<vmem>>, vector<4x384xf32>
    tpu.vector_store %arg13[%c4, %c75_17], %36 {strides = array<i32>} : memref<8x536xf32, #tpu.memory_space<vmem>>, vector<4x384xf32>,
    %c0_18 = arith.constant 0 : index
    %c0_19 = arith.constant 0 : index
    %c0_20 = arith.constant 0 : index
    %38 = vector.load %arg6[%c0_18, %c0_19, %c0_20] : memref<9x4x8xf32, #tpu.memory_space<vmem>>, vector<1x4x8xf32>
    %39 = vector.shape_cast %38 : vector<1x4x8xf32> to vector<4x8xf32>
    %c0_21 = arith.constant 0 : index
    %c0_22 = arith.constant 0 : index
    %40 = vector.load %arg13[%c0_21, %c0_22] : memref<8x536xf32, #tpu.memory_space<vmem>>, vector<8x384xf32>
    %cst_23 = arith.constant dense<0.000000e+00> : vector<4x384xf32>
    %41 = tpu.matmul %39, %40, %cst_23 {dimension_numbers = #tpu.dot_dimension_numbers<[1], [0], [0], [1], [0, 0, 1, 1], [], []>} : vector<4x8xf32>, vector<8x384xf32>, vector<4x384xf32> -> vector<4x384xf32>
    %c1 = arith.constant 1 : index
    %c0_24 = arith.constant 0 : index
    %c0_25 = arith.constant 0 : index
    %42 = vector.load %arg6[%c1, %c0_24, %c0_25] : memref<9x4x8xf32, #tpu.memory_space<vmem>>, vector<1x4x8xf32>
    %43 = vector.shape_cast %42 : vector<1x4x8xf32> to vector<4x8xf32>
    %c0_26 = arith.constant 0 : index
    %c3 = arith.constant 3 : index
    %44 = vector.load %arg13[%c0_26, %c3] : memref<8x536xf32, #tpu.memory_space<vmem>>, vector<8x384xf32>
    %cst_27 = arith.constant dense<0.000000e+00> : vector<4x384xf32>
    %45 = tpu.matmul %43, %44, %cst_27 {dimension_numbers = #tpu.dot_dimension_numbers<[1], [0], [0], [1], [0, 0, 1, 1], [], []>} : vector<4x8xf32>, vector<8x384xf32>, vector<4x384xf32> -> vector<4x384xf32>
    %46 = arith.addf %41, %45 : vector<4x384xf32>
    %c2 = arith.constant 2 : index
    %c0_28 = arith.constant 0 : index
    %c0_29 = arith.constant 0 : index
    %47 = vector.load %arg6[%c2, %c0_28, %c0_29] : memref<9x4x8xf32, #tpu.memory_space<vmem>>, vector<1x4x8xf32>
    %48 = vector.shape_cast %47 : vector<1x4x8xf32> to vector<4x8xf32>
    %c0_30 = arith.constant 0 : index
    %c6 = arith.constant 6 : index
    %49 = vector.load %arg13[%c0_30, %c6] : memref<8x536xf32, #tpu.memory_space<vmem>>, vector<8x384xf32>
    %cst_31 = arith.constant dense<0.000000e+00> : vector<4x384xf32>
    %50 = tpu.matmul %48, %49, %cst_31 {dimension_numbers = #tpu.dot_dimension_numbers<[1], [0], [0], [1], [0, 0, 1, 1], [], []>} : vector<4x8xf32>, vector<8x384xf32>, vector<4x384xf32> -> vector<4x384xf32>
    %51 = arith.addf %46, %50 : vector<4x384xf32>
    %c3_32 = arith.constant 3 : index
    %c0_33 = arith.constant 0 : index
    %c0_34 = arith.constant 0 : index
    %52 = vector.load %arg6[%c3_32, %c0_33, %c0_34] : memref<9x4x8xf32, #tpu.memory_space<vmem>>, vector<1x4x8xf32>
    %53 = vector.shape_cast %52 : vector<1x4x8xf32> to vector<4x8xf32>
    %c0_35 = arith.constant 0 : index
    %c72 = arith.constant 72 : index
    %54 = vector.load %arg13[%c0_35, %c72] : memref<8x536xf32, #tpu.memory_space<vmem>>, vector<8x384xf32>
    %cst_36 = arith.constant dense<0.000000e+00> : vector<4x384xf32>
    %55 = tpu.matmul %53, %54, %cst_36 {dimension_numbers = #tpu.dot_dimension_numbers<[1], [0], [0], [1], [0, 0, 1, 1], [], []>} : vector<4x8xf32>, vector<8x384xf32>, vector<4x384xf32> -> vector<4x384xf32>
    %56 = arith.addf %51, %55 : vector<4x384xf32>
    %c4_37 = arith.constant 4 : index
    %c0_38 = arith.constant 0 : index
    %c0_39 = arith.constant 0 : index
    %57 = vector.load %arg6[%c4_37, %c0_38, %c0_39] : memref<9x4x8xf32, #tpu.memory_space<vmem>>, vector<1x4x8xf32>
    %58 = vector.shape_cast %57 : vector<1x4x8xf32> to vector<4x8xf32>
    %c0_40 = arith.constant 0 : index
    %c75_41 = arith.constant 75 : index
    %59 = vector.load %arg13[%c0_40, %c75_41] : memref<8x536xf32, #tpu.memory_space<vmem>>, vector<8x384xf32>
    %cst_42 = arith.constant dense<0.000000e+00> : vector<4x384xf32>
    %60 = tpu.matmul %58, %59, %cst_42 {dimension_numbers = #tpu.dot_dimension_numbers<[1], [0], [0], [1], [0, 0, 1, 1], [], []>} : vector<4x8xf32>, vector<8x384xf32>, vector<4x384xf32> -> vector<4x384xf32>
    %61 = arith.addf %56, %60 : vector<4x384xf32>
    %c5 = arith.constant 5 : index
    %c0_43 = arith.constant 0 : index
    %c0_44 = arith.constant 0 : index
    %62 = vector.load %arg6[%c5, %c0_43, %c0_44] : memref<9x4x8xf32, #tpu.memory_space<vmem>>, vector<1x4x8xf32>
    %63 = vector.shape_cast %62 : vector<1x4x8xf32> to vector<4x8xf32>
    %c0_45 = arith.constant 0 : index
    %c78 = arith.constant 78 : index
    %64 = vector.load %arg13[%c0_45, %c78] : memref<8x536xf32, #tpu.memory_space<vmem>>, vector<8x384xf32>
    %cst_46 = arith.constant dense<0.000000e+00> : vector<4x384xf32>
    %65 = tpu.matmul %63, %64, %cst_46 {dimension_numbers = #tpu.dot_dimension_numbers<[1], [0], [0], [1], [0, 0, 1, 1], [], []>} : vector<4x8xf32>, vector<8x384xf32>, vector<4x384xf32> -> vector<4x384xf32>
    %66 = arith.addf %61, %65 : vector<4x384xf32>
    %c6_47 = arith.constant 6 : index
    %c0_48 = arith.constant 0 : index
    %c0_49 = arith.constant 0 : index
    %67 = vector.load %arg6[%c6_47, %c0_48, %c0_49] : memref<9x4x8xf32, #tpu.memory_space<vmem>>, vector<1x4x8xf32>
    %68 = vector.shape_cast %67 : vector<1x4x8xf32> to vector<4x8xf32>
    %c0_50 = arith.constant 0 : index
    %c144 = arith.constant 144 : index
    %69 = vector.load %arg13[%c0_50, %c144] : memref<8x536xf32, #tpu.memory_space<vmem>>, vector<8x384xf32>
    %cst_51 = arith.constant dense<0.000000e+00> : vector<4x384xf32>
    %70 = tpu.matmul %68, %69, %cst_51 {dimension_numbers = #tpu.dot_dimension_numbers<[1], [0], [0], [1], [0, 0, 1, 1], [], []>} : vector<4x8xf32>, vector<8x384xf32>, vector<4x384xf32> -> vector<4x384xf32>
    %71 = arith.addf %66, %70 : vector<4x384xf32>
    %c7 = arith.constant 7 : index
    %c0_52 = arith.constant 0 : index
    %c0_53 = arith.constant 0 : index
    %72 = vector.load %arg6[%c7, %c0_52, %c0_53] : memref<9x4x8xf32, #tpu.memory_space<vmem>>, vector<1x4x8xf32>
    %73 = vector.shape_cast %72 : vector<1x4x8xf32> to vector<4x8xf32>
    %c0_54 = arith.constant 0 : index
    %c147 = arith.constant 147 : index
    %74 = vector.load %arg13[%c0_54, %c147] : memref<8x536xf32, #tpu.memory_space<vmem>>, vector<8x384xf32>
    %cst_55 = arith.constant dense<0.000000e+00> : vector<4x384xf32>
    %75 = tpu.matmul %73, %74, %cst_55 {dimension_numbers = #tpu.dot_dimension_numbers<[1], [0], [0], [1], [0, 0, 1, 1], [], []>} : vector<4x8xf32>, vector<8x384xf32>, vector<4x384xf32> -> vector<4x384xf32>
    %76 = arith.addf %71, %75 : vector<4x384xf32>
    %c8 = arith.constant 8 : index
    %c0_56 = arith.constant 0 : index
    %c0_57 = arith.constant 0 : index
    %77 = vector.load %arg6[%c8, %c0_56, %c0_57] : memref<9x4x8xf32, #tpu.memory_space<vmem>>, vector<1x4x8xf32>
    %78 = vector.shape_cast %77 : vector<1x4x8xf32> to vector<4x8xf32>
    %c0_58 = arith.constant 0 : index
    %c150 = arith.constant 150 : index
    %79 = vector.load %arg13[%c0_58, %c150] : memref<8x536xf32, #tpu.memory_space<vmem>>, vector<8x384xf32>
    %cst_59 = arith.constant dense<0.000000e+00> : vector<4x384xf32>
    %80 = tpu.matmul %78, %79, %cst_59 {dimension_numbers = #tpu.dot_dimension_numbers<[1], [0], [0], [1], [0, 0, 1, 1], [], []>} : vector<4x8xf32>, vector<8x384xf32>, vector<4x384xf32> -> vector<4x384xf32>
    %81 = arith.addf %76, %80 : vector<4x384xf32>
    %c0_60 = arith.constant 0 : index
    %c0_61 = arith.constant 0 : index
    %82 = vector.load %arg7[%c0_60, %c0_61] : memref<4x1xf32, #tpu.memory_space<vmem>>, vector<4x1xf32>
    %83 = vector.broadcast %82 : vector<4x1xf32> to vector<4x384xf32>
    %84 = arith.mulf %81, %83 : vector<4x384xf32>
    %c0_62 = arith.constant 0 : index
    %c0_63 = arith.constant 0 : index
    %85 = vector.load %arg8[%c0_62, %c0_63] : memref<4x1xf32, #tpu.memory_space<vmem>>, vector<4x1xf32>
    %86 = vector.broadcast %85 : vector<4x1xf32> to vector<4x384xf32>
    %87 = arith.addf %84, %86 : vector<4x384xf32>
    %cst_64 = arith.constant 0.000000e+00 : f32
    %88 = vector.broadcast %cst_64 : f32 to vector<4x384xf32>
    %89 = arith.maximumf %87, %88 : vector<4x384xf32>
    %90 = vector.extract_strided_slice %0 {offsets = [4, 0], sizes = [1, 384], strides = [1, 1]} : vector<5x384xf32> to vector<1x384xf32>
    %91 = vector.broadcast %90 : vector<1x384xf32> to vector<4x384xf32>
    %92 = arith.mulf %89, %91 : vector<4x384xf32>
    %cst_65 = arith.constant 0.000000e+00 : f32
    %93 = vector.broadcast %cst_65 : f32 to vector<4x75xf32>
    %c0_66 = arith.constant 0 : index
    %c0_67 = arith.constant 0 : index
    %94 = vector.load %arg14[%c0_66, %c0_67] : memref<4x536xf32, #tpu.memory_space<vmem>>, vector<4x75xf32>
    tpu.vector_store %arg14[%c0_66, %c0_67], %93 {strides = array<i32>} : memref<4x536xf32, #tpu.memory_space<vmem>>, vector<4x75xf32>,
    %cst_68 = arith.constant 0.000000e+00 : f32
    %95 = vector.broadcast %cst_68 : f32 to vector<4x77xf32>
    %c0_69 = arith.constant 0 : index
    %c459_70 = arith.constant 459 : index
    %96 = vector.load %arg14[%c0_69, %c459_70] : memref<4x536xf32, #tpu.memory_space<vmem>>, vector<4x77xf32>
    tpu.vector_store %arg14[%c0_69, %c459_70], %95 {strides = array<i32>} : memref<4x536xf32, #tpu.memory_space<vmem>>, vector<4x77xf32>,
    %c0_71 = arith.constant 0 : index
    %c75_72 = arith.constant 75 : index
    %97 = vector.load %arg14[%c0_71, %c75_72] : memref<4x536xf32, #tpu.memory_space<vmem>>, vector<4x384xf32>
    tpu.vector_store %arg14[%c0_71, %c75_72], %92 {strides = array<i32>} : memref<4x536xf32, #tpu.memory_space<vmem>>, vector<4x384xf32>,
    %c0_73 = arith.constant 0 : index
    %c0_74 = arith.constant 0 : index
    %c0_75 = arith.constant 0 : index
    %98 = vector.load %arg9[%c0_73, %c0_74, %c0_75] : memref<9x4x4xf32, #tpu.memory_space<vmem>>, vector<1x4x4xf32>
    %99 = vector.shape_cast %98 : vector<1x4x4xf32> to vector<4x4xf32>
    %c0_76 = arith.constant 0 : index
    %c0_77 = arith.constant 0 : index
    %100 = vector.load %arg14[%c0_76, %c0_77] : memref<4x536xf32, #tpu.memory_space<vmem>>, vector<4x384xf32>
    %cst_78 = arith.constant dense<0.000000e+00> : vector<4x384xf32>
    %101 = tpu.matmul %99, %100, %cst_78 {dimension_numbers = #tpu.dot_dimension_numbers<[1], [0], [0], [1], [0, 0, 1, 1], [], []>} : vector<4x4xf32>, vector<4x384xf32>, vector<4x384xf32> -> vector<4x384xf32>
    %c1_79 = arith.constant 1 : index
    %c0_80 = arith.constant 0 : index
    %c0_81 = arith.constant 0 : index
    %102 = vector.load %arg9[%c1_79, %c0_80, %c0_81] : memref<9x4x4xf32, #tpu.memory_space<vmem>>, vector<1x4x4xf32>
    %103 = vector.shape_cast %102 : vector<1x4x4xf32> to vector<4x4xf32>
    %c0_82 = arith.constant 0 : index
    %c3_83 = arith.constant 3 : index
    %104 = vector.load %arg14[%c0_82, %c3_83] : memref<4x536xf32, #tpu.memory_space<vmem>>, vector<4x384xf32>
    %cst_84 = arith.constant dense<0.000000e+00> : vector<4x384xf32>
    %105 = tpu.matmul %103, %104, %cst_84 {dimension_numbers = #tpu.dot_dimension_numbers<[1], [0], [0], [1], [0, 0, 1, 1], [], []>} : vector<4x4xf32>, vector<4x384xf32>, vector<4x384xf32> -> vector<4x384xf32>
    %106 = arith.addf %101, %105 : vector<4x384xf32>
    %c2_85 = arith.constant 2 : index
    %c0_86 = arith.constant 0 : index
    %c0_87 = arith.constant 0 : index
    %107 = vector.load %arg9[%c2_85, %c0_86, %c0_87] : memref<9x4x4xf32, #tpu.memory_space<vmem>>, vector<1x4x4xf32>
    %108 = vector.shape_cast %107 : vector<1x4x4xf32> to vector<4x4xf32>
    %c0_88 = arith.constant 0 : index
    %c6_89 = arith.constant 6 : index
    %109 = vector.load %arg14[%c0_88, %c6_89] : memref<4x536xf32, #tpu.memory_space<vmem>>, vector<4x384xf32>
    %cst_90 = arith.constant dense<0.000000e+00> : vector<4x384xf32>
    %110 = tpu.matmul %108, %109, %cst_90 {dimension_numbers = #tpu.dot_dimension_numbers<[1], [0], [0], [1], [0, 0, 1, 1], [], []>} : vector<4x4xf32>, vector<4x384xf32>, vector<4x384xf32> -> vector<4x384xf32>
    %111 = arith.addf %106, %110 : vector<4x384xf32>
    %c3_91 = arith.constant 3 : index
    %c0_92 = arith.constant 0 : index
    %c0_93 = arith.constant 0 : index
    %112 = vector.load %arg9[%c3_91, %c0_92, %c0_93] : memref<9x4x4xf32, #tpu.memory_space<vmem>>, vector<1x4x4xf32>
    %113 = vector.shape_cast %112 : vector<1x4x4xf32> to vector<4x4xf32>
    %c0_94 = arith.constant 0 : index
    %c72_95 = arith.constant 72 : index
    %114 = vector.load %arg14[%c0_94, %c72_95] : memref<4x536xf32, #tpu.memory_space<vmem>>, vector<4x384xf32>
    %cst_96 = arith.constant dense<0.000000e+00> : vector<4x384xf32>
    %115 = tpu.matmul %113, %114, %cst_96 {dimension_numbers = #tpu.dot_dimension_numbers<[1], [0], [0], [1], [0, 0, 1, 1], [], []>} : vector<4x4xf32>, vector<4x384xf32>, vector<4x384xf32> -> vector<4x384xf32>
    %116 = arith.addf %111, %115 : vector<4x384xf32>
    %c4_97 = arith.constant 4 : index
    %c0_98 = arith.constant 0 : index
    %c0_99 = arith.constant 0 : index
    %117 = vector.load %arg9[%c4_97, %c0_98, %c0_99] : memref<9x4x4xf32, #tpu.memory_space<vmem>>, vector<1x4x4xf32>
    %118 = vector.shape_cast %117 : vector<1x4x4xf32> to vector<4x4xf32>
    %c0_100 = arith.constant 0 : index
    %c75_101 = arith.constant 75 : index
    %119 = vector.load %arg14[%c0_100, %c75_101] : memref<4x536xf32, #tpu.memory_space<vmem>>, vector<4x384xf32>
    %cst_102 = arith.constant dense<0.000000e+00> : vector<4x384xf32>
    %120 = tpu.matmul %118, %119, %cst_102 {dimension_numbers = #tpu.dot_dimension_numbers<[1], [0], [0], [1], [0, 0, 1, 1], [], []>} : vector<4x4xf32>, vector<4x384xf32>, vector<4x384xf32> -> vector<4x384xf32>
    %121 = arith.addf %116, %120 : vector<4x384xf32>
    %c5_103 = arith.constant 5 : index
    %c0_104 = arith.constant 0 : index
    %c0_105 = arith.constant 0 : index
    %122 = vector.load %arg9[%c5_103, %c0_104, %c0_105] : memref<9x4x4xf32, #tpu.memory_space<vmem>>, vector<1x4x4xf32>
    %123 = vector.shape_cast %122 : vector<1x4x4xf32> to vector<4x4xf32>
    %c0_106 = arith.constant 0 : index
    %c78_107 = arith.constant 78 : index
    %124 = vector.load %arg14[%c0_106, %c78_107] : memref<4x536xf32, #tpu.memory_space<vmem>>, vector<4x384xf32>
    %cst_108 = arith.constant dense<0.000000e+00> : vector<4x384xf32>
    %125 = tpu.matmul %123, %124, %cst_108 {dimension_numbers = #tpu.dot_dimension_numbers<[1], [0], [0], [1], [0, 0, 1, 1], [], []>} : vector<4x4xf32>, vector<4x384xf32>, vector<4x384xf32> -> vector<4x384xf32>
    %126 = arith.addf %121, %125 : vector<4x384xf32>
    %c6_109 = arith.constant 6 : index
    %c0_110 = arith.constant 0 : index
    %c0_111 = arith.constant 0 : index
    %127 = vector.load %arg9[%c6_109, %c0_110, %c0_111] : memref<9x4x4xf32, #tpu.memory_space<vmem>>, vector<1x4x4xf32>
    %128 = vector.shape_cast %127 : vector<1x4x4xf32> to vector<4x4xf32>
    %c0_112 = arith.constant 0 : index
    %c144_113 = arith.constant 144 : index
    %129 = vector.load %arg14[%c0_112, %c144_113] : memref<4x536xf32, #tpu.memory_space<vmem>>, vector<4x384xf32>
    %cst_114 = arith.constant dense<0.000000e+00> : vector<4x384xf32>
    %130 = tpu.matmul %128, %129, %cst_114 {dimension_numbers = #tpu.dot_dimension_numbers<[1], [0], [0], [1], [0, 0, 1, 1], [], []>} : vector<4x4xf32>, vector<4x384xf32>, vector<4x384xf32> -> vector<4x384xf32>
    %131 = arith.addf %126, %130 : vector<4x384xf32>
    %c7_115 = arith.constant 7 : index
    %c0_116 = arith.constant 0 : index
    %c0_117 = arith.constant 0 : index
    %132 = vector.load %arg9[%c7_115, %c0_116, %c0_117] : memref<9x4x4xf32, #tpu.memory_space<vmem>>, vector<1x4x4xf32>
    %133 = vector.shape_cast %132 : vector<1x4x4xf32> to vector<4x4xf32>
    %c0_118 = arith.constant 0 : index
    %c147_119 = arith.constant 147 : index
    %134 = vector.load %arg14[%c0_118, %c147_119] : memref<4x536xf32, #tpu.memory_space<vmem>>, vector<4x384xf32>
    %cst_120 = arith.constant dense<0.000000e+00> : vector<4x384xf32>
    %135 = tpu.matmul %133, %134, %cst_120 {dimension_numbers = #tpu.dot_dimension_numbers<[1], [0], [0], [1], [0, 0, 1, 1], [], []>} : vector<4x4xf32>, vector<4x384xf32>, vector<4x384xf32> -> vector<4x384xf32>
    %136 = arith.addf %131, %135 : vector<4x384xf32>
    %c8_121 = arith.constant 8 : index
    %c0_122 = arith.constant 0 : index
    %c0_123 = arith.constant 0 : index
    %137 = vector.load %arg9[%c8_121, %c0_122, %c0_123] : memref<9x4x4xf32, #tpu.memory_space<vmem>>, vector<1x4x4xf32>
    %138 = vector.shape_cast %137 : vector<1x4x4xf32> to vector<4x4xf32>
    %c0_124 = arith.constant 0 : index
    %c150_125 = arith.constant 150 : index
    %139 = vector.load %arg14[%c0_124, %c150_125] : memref<4x536xf32, #tpu.memory_space<vmem>>, vector<4x384xf32>
    %cst_126 = arith.constant dense<0.000000e+00> : vector<4x384xf32>
    %140 = tpu.matmul %138, %139, %cst_126 {dimension_numbers = #tpu.dot_dimension_numbers<[1], [0], [0], [1], [0, 0, 1, 1], [], []>} : vector<4x4xf32>, vector<4x384xf32>, vector<4x384xf32> -> vector<4x384xf32>
    %141 = arith.addf %136, %140 : vector<4x384xf32>
    %c0_127 = arith.constant 0 : index
    %c0_128 = arith.constant 0 : index
    %142 = vector.load %arg10[%c0_127, %c0_128] : memref<4x1xf32, #tpu.memory_space<vmem>>, vector<4x1xf32>
    %143 = vector.broadcast %142 : vector<4x1xf32> to vector<4x384xf32>
    %144 = arith.mulf %141, %143 : vector<4x384xf32>
    %c0_129 = arith.constant 0 : index
    %c0_130 = arith.constant 0 : index
    %145 = vector.load %arg11[%c0_129, %c0_130] : memref<4x1xf32, #tpu.memory_space<vmem>>, vector<4x1xf32>
    %146 = vector.broadcast %145 : vector<4x1xf32> to vector<4x384xf32>
    %147 = arith.addf %144, %146 : vector<4x384xf32>
    %cst_131 = arith.constant 0.000000e+00 : f32
    %148 = vector.broadcast %cst_131 : f32 to vector<4x384xf32>
    %149 = arith.maximumf %147, %148 : vector<4x384xf32>
    %c0_132 = arith.constant 0 : index
    %c0_133 = arith.constant 0 : index
    %c0_134 = arith.constant 0 : index
    %150 = vector.load %arg12[%c0_132, %c0_133, %c0_134] : memref<1x4x384xf32, #tpu.memory_space<vmem>>, vector<1x4x384xf32>
    %151 = vector.shape_cast %150 : vector<1x4x384xf32> to vector<4x384xf32>
    %152 = vector.shape_cast %149 : vector<4x384xf32> to vector<1x4x384xf32>
    tpu.vector_store %arg12[%c0_132, %c0_133, %c0_134], %152 {strides = array<i32>} : memref<1x4x384xf32, #tpu.memory_space<vmem>>, vector<1x4x384xf32>,
    return
  }
  func.func @transform_0(%arg0: i32) -> (i32, i32) {
    %c0_i32 = arith.constant 0 : i32
    %c0_i32_0 = arith.constant 0 : i32
    %c0_i32_1 = arith.constant 0 : i32
    return %c0_i32, %c0_i32_0 : i32, i32
  }
  func.func @transform_1(%arg0: i32) -> (i32, i32, i32) {
    %c0_i32 = arith.constant 0 : i32
    %c0_i32_0 = arith.constant 0 : i32
    %c0_i32_1 = arith.constant 0 : i32
    return %arg0, %c0_i32, %c0_i32_0 : i32, i32, i32
  }
  func.func @transform_2(%arg0: i32) -> (i32, i32, i32) {
    %c0_i32 = arith.constant 0 : i32
    %c0_i32_0 = arith.constant 0 : i32
    %c0_i32_1 = arith.constant 0 : i32
    return %arg0, %c0_i32, %c0_i32_0 : i32, i32, i32
  }
  func.func @transform_3(%arg0: i32) -> (i32, i32) {
    %c0_i32 = arith.constant 0 : i32
    %c0_i32_0 = arith.constant 0 : i32
    %c0_i32_1 = arith.constant 0 : i32
    return %c0_i32, %c0_i32_0 : i32, i32
  }
  func.func @transform_4(%arg0: i32) -> (i32, i32) {
    %c0_i32 = arith.constant 0 : i32
    %c0_i32_0 = arith.constant 0 : i32
    %c0_i32_1 = arith.constant 0 : i32
    return %c0_i32, %c0_i32_0 : i32, i32
  }
  func.func @transform_5(%arg0: i32) -> (i32, i32, i32) {
    %c0_i32 = arith.constant 0 : i32
    %c0_i32_0 = arith.constant 0 : i32
    %c0_i32_1 = arith.constant 0 : i32
    %c0_i32_2 = arith.constant 0 : i32
    return %c0_i32, %c0_i32_0, %c0_i32_1 : i32, i32, i32
  }
  func.func @transform_6(%arg0: i32) -> (i32, i32) {
    %c0_i32 = arith.constant 0 : i32
    %c0_i32_0 = arith.constant 0 : i32
    %c0_i32_1 = arith.constant 0 : i32
    return %c0_i32, %c0_i32_0 : i32, i32
  }
  func.func @transform_7(%arg0: i32) -> (i32, i32) {
    %c0_i32 = arith.constant 0 : i32
    %c0_i32_0 = arith.constant 0 : i32
    %c0_i32_1 = arith.constant 0 : i32
    return %c0_i32, %c0_i32_0 : i32, i32
  }
  func.func @transform_8(%arg0: i32) -> (i32, i32, i32) {
    %c0_i32 = arith.constant 0 : i32
    %c0_i32_0 = arith.constant 0 : i32
    %c0_i32_1 = arith.constant 0 : i32
    %c0_i32_2 = arith.constant 0 : i32
    return %c0_i32, %c0_i32_0, %c0_i32_1 : i32, i32, i32
  }
  func.func @transform_9(%arg0: i32) -> (i32, i32) {
    %c0_i32 = arith.constant 0 : i32
    %c0_i32_0 = arith.constant 0 : i32
    %c0_i32_1 = arith.constant 0 : i32
    return %c0_i32, %c0_i32_0 : i32, i32
  }
  func.func @transform_10(%arg0: i32) -> (i32, i32) {
    %c0_i32 = arith.constant 0 : i32
    %c0_i32_0 = arith.constant 0 : i32
    %c0_i32_1 = arith.constant 0 : i32
    return %c0_i32, %c0_i32_0 : i32, i32
  }
  func.func @transform_11(%arg0: i32) -> (i32, i32, i32) {
    %c0_i32 = arith.constant 0 : i32
    %c0_i32_0 = arith.constant 0 : i32
    %c0_i32_1 = arith.constant 0 : i32
    return %arg0, %c0_i32, %c0_i32_0 : i32, i32, i32
  }
}

</mosaic_0001>

<bundles_post_ra>
// kernel: tpu_custom_call.1
= control target key start
LH: loop header
LB: loop body
LE: loop exit
PB: predicated region body
PF: predicated region fallthrough
CT: control target
= control target key end

     0   :  { %s4867_s0 = inlined_call_operand.vmem [shape: f32[5,384], index: 0, kind: input, shape index: {}]   ;;  %s4868_s1 = inlined_call_operand.vmem [shape: f32[2,8,384], index: 1, kind: input, shape index: {}]   ;;  %s4869_s2 = inlined_call_operand.vmem [shape: f32[2,4,384], index: 2, kind: input, shape index: {}]   ;;  %s4870_s3 = inlined_call_operand.vmem [shape: f32[16,8], index: 3, kind: input, shape index: {}]   ;;  %s4871_s4 = inlined_call_operand.vmem [shape: f32[4,1], index: 4, kind: input, shape index: {}]   ;;  %s4872_s5 = inlined_call_operand.vmem [shape: f32[9,4,8], index: 5, kind: input, shape index: {}]   ;;  %s4873_s6 = inlined_call_operand.vmem [shape: f32[4,1], index: 6, kind: input, shape index: {}]   ;;  %s4874_s7 = inlined_call_operand.vmem [shape: f32[4,1], index: 7, kind: input, shape index: {}]   ;;  %s4875_s8 = inlined_call_operand.vmem [shape: f32[9,4,4], index: 8, kind: input, shape index: {}]   ;;  %s4876_s9 = inlined_call_operand.vmem [shape: f32[4,1], index: 9, kind: input, shape index: {}]   ;;  %s4877_s10 = inlined_call_operand.vmem [shape: f32[4,1], index: 10, kind: input, shape index: {}]   ;;  %s4878_s11 = inlined_call_operand.hbm [shape: f32[2,4,384], index: 11, kind: output, shape index: {}]  }
   0x1   :  { %4885 = sst [smem:[#allocation7_spill]] %s4867_s0 }
   0x2   :  { %16 = vsyncpa [#allocation5], 0 }
   0x3   :  { %18 = vsyncpa [#allocation5 + $0x1], 0  ;;  %s4317_s17 = smov 0   ;;  %s4319_s18 = smov 0  }
   0x4   :  { %s4321_s19 = smov 0   ;;  %s4323_s20 = smov 0  }
   0x5 LB: > { %s4338_s21 = sadd.s32 4294967295, %s4242_s20   ;;  %s3893_s22 = sadd.s32 4294967294, %s4242_s20   ;;  %s4242_s20 = sphi %s4323_s20, %s4895_s20   ;;  %s4238_s19 = sphi %s4321_s19, %s4894_s19   ;;  %s4234_s18 = sphi %s4319_s18, %s4893_s18   ;;  %s4230_s17 = sphi %s4317_s17, %s4892_s17  }
   0x6   : > { %s4342_s23 = sadd.s32 1, %s4242_s20   ;;  %s272_s24 = sadd.s32 1, %s4238_s19 }
   0x7   : > { %s269_s25 = ssub.s32 %s4242_s20, %s4342_s23  ;;  %p282_p0 = scmp.ne.s32.totalorder %s4238_s19, %s4234_s18 }
   0x8   : > { %p270_p1 = scmp.eq.s32.totalorder %s269_s25, 0  ;;  %p283_p2 = scmp.eq.s32.totalorder %s4338_s21, 1 }
   0x9   : > { %p288_p3 = scmp.ne.s32.totalorder %s4234_s18, %s4230_s17  ;;  %p289_p4 = scmp.eq.s32.totalorder %s3893_s22, 1 }
   0xa   : > { %s4353_s26 = scalar_select %p270_p1, %s4238_s19, %s272_s24  }
   0xb   : > { %p4355_p5 = por %p283_p2, %p282_p0  ;;  %p4359_p6 = por %p289_p4, %p288_p3 }
   0xc   : > { %p3896_p7 = scmp.ge.s32.totalorder %s4242_s20, 1  ;;  %p350_p8 = scmp.lt.s32.totalorder %s4242_s20, 3 }
   0xe   : > { %p351_p9 = pnand %p3896_p7, %p350_p8 }
   0xf   : > { %p395_p10 = scmp.lt.s32.totalorder (!%p351_p9), %s4338_s21, 1  ;;  %s4246_s16 = smov (!%p351_p9), 75  }
  0x10   : > { %354 = sbr.rel (%p351_p9) target bundleno = 1259 (0x4eb), region = 64  ;;  %s4888_s0 = sld [smem:[#allocation7_spill]] (!%p351_p9) }
  0x11   : > { %s4883_s12 = smov (!%p351_p9), 56   ;;  %s4248_s13 = smov (!%p351_p9), 125  }
  0x12   : > { %s4879_s22 = smov (!%p351_p9), 50   ;;  %s4254_s25 = smov (!%p351_p9), 109  }
  0x13   : > { %s4255_s29 = smov (!%p351_p9), 106  }
  0x15   : > { %v408_v0 = vld [vmem:[%s4870_s3] sm:$0xff]  ;;  %vm413_vm0 = vcmask 64512   ;;  %v4244_v1 = vmov 0.0   ;;  %s396_s14 = scalar_select %p395_p10, %s4338_s21, 1  ;;  %v4245_v3 = vmov 0   ;;  %v409_v4 = vld [vmem:[%s4870_s3 + $0x8] sm:$0xff]  ;;  %v572_v10 = vlaneseq }
  0x16   : > { %484 = vmatprep.mubr.f32.mxu0 %v4244_v1  ;;  %4026 = vmatprep.mubr.msk.f32.mxu1 %vm413_vm0, %v408_v0  ;;  %v659_v2 = vld [vmem:[%s4871_s4] sm:$0xf]  ;;  %vm683_vm1 = vcmask 613376   ;;  %vm704_vm2 = vcmask 1044056   ;;  %vm2229_vm3 = vcmask 195588   ;;  %vm728_vm5 = vcmask 1048156  }
  0x17   : > { %4174 = vset.pattern.permute.xlu0 %v4245_v3  ;;  %4175 = vset.pattern.permute.xlu1 %v4245_v3  ;;  %s4120_s15 = smul.u32 24, %s396_s14  ;;  %684 = vst.msk [vmem:[#allocation2] sm:$0xff] %vm683_vm1, %v4244_v1  ;;  %vm2230_vm4 = vmor %vm2229_vm3, %vm704_vm2  ;;  %v573_v11 = vshrl.u32 %v572_v10, 7  ;;  %v405_v14 = vld [vmem:[%s4888_s0] sm:$0x1f]  ;;  %vm685_vm6 = vcmask 1048152  }
  0x18   : > { %662 = vperm.xlu0 %4174, %v659_v2   ;;  %s4121_s30 = smul.u32 12, %s396_s14  ;;  %2231 = vst.msk [vmem:[#allocation3 + $0xc] sm:$0xff] %vm2230_vm4, %v4244_v1  ;;  %v406_v17 = vld [vmem:[%s4888_s0 + $0x8] sm:$0x1f]  ;;  %v407_v20 = vld [vmem:[%s4888_s0 + $0x10] sm:$0x1f] }
  0x19   : > { %s399_s24 = scalar_lea.vmem %s4868_s1, %s4120_s15  ;;  %v589_v13 = vsub.s32 1, %v573_v11  ;;  %v574_v15 = vsub.s32 0, %v573_v11  ;;  %v667_v16 = vsub.s32 4, %v573_v11  ;;  %v616_v21 = vsub.s32 2, %v573_v11  ;;  %686 = vst.msk [vmem:[#allocation2 + $0x18] sm:$0xff] %vm685_vm6, %v4244_v1  ;;  %s4250_s14 = smov 122  }
  0x1a   : > { %v411_v5 = vld [vmem:[%s399_s24 + $0x8] sm:$0xff]  ;;  %v412_v6 = vld [vmem:[%s399_s24 + $0x10] sm:$0xff]  ;;  %v410_v7 = vld [vmem:[%s399_s24] sm:$0xff]  ;;  %s4390_s15 = scalar_lea.vmem %s4869_s2, %s4121_s30  ;;  %v634_v22 = vsub.s32 3, %v573_v11  ;;  %vm708_vm7 = vcmask 609280   ;;  %vm687_vm8 = vcmask 195584  }
  0x1b   : > { %450 = vmatprep.subr.mxu0 %v411_v5  ;;  %4024 = vmatprep.subr.mxu1 %v412_v6  ;;  %v4393_v8 = vld [vmem:[%s4390_s15] sm:$0xff]  ;;  %v590_v19 = vrot.slane %v405_v14, %v589_v13  ;;  %v575_v23 = vrot.slane %v405_v14, %v574_v15  ;;  %v594_v24 = vrot.slane %v406_v17, %v589_v13  ;;  %v4177_v10 = vld [vmem:[%s4390_s15 + $0x8] ss:$0 sps:$4 sm:$0xff]   ;;  %vm732_vm9 = vcmask 613380   ;;  %s4881_s15 = smov 53   ;;  %s4253_s24 = smov 112  }
  0x1c   : > { %451 = vmatpush1.msra.mxu0 %v410_v7  ;;  %4025 = vmatpush3.msra.mxu1 %v412_v6  ;;  %v714_v9 = vcombine.low %v4393_v8, %v4393_v8  ;;  %v4416_v25 = vrot.slane %v405_v14, %v667_v16  ;;  %v579_v28 = vrot.slane %v406_v17, %v574_v15  ;;  %vm4251_vm10 = vmmov 0  }
  0x1d   : > { %3899 = vmatmul.mubr.msk.f32.vlgmr.msra.gmra.mxu0 %vm413_vm0, %v408_v0  ;;  %4027 = vmatmul.mubr.msk.f32.vlgmr.msra.gmra.mxu1 %vm413_vm0, %v409_v4  ;;  %v583_v29 = vrot.slane %v407_v20, %v574_v15  ;;  %v598_v30 = vrot.slane %v407_v20, %v589_v13  ;;  %v617_v32 = vrot.slane %v405_v14, %v616_v21  ;;  %vm753_vm11 = vcmask 1022976  }
  0x1e   : > { %490 = vmatprep.mubr.f32.mxu0 %v4244_v1  ;;  %4029 = vmatprep.subr.mxu0 %v4244_v1  ;;  %v635_v33 = vrot.slane %v405_v14, %v634_v22  ;;  %v625_v34 = vrot.slane %v407_v20, %v616_v21  ;;  %v643_v35 = vrot.slane %v407_v20, %v634_v22  ;;  %vm1058_vm12 = vcmask 998400  }
  0x1f   : > { %827 = vmatprep.mubr.f32.mxu1 %v4244_v1  ;;  %716 = vrot.lane.b32.xlu0 %v714_v9, %s4246_s16  ;;  %v621_v38 = vrot.slane %v406_v17, %v616_v21  ;;  %v639_v39 = vrot.slane %v406_v17, %v634_v22  ;;  %2228 = vst.msk [vmem:[#allocation3] sm:$0xf] %vm708_vm7, %v4244_v1  ;;  %vm1222_vm13 = vcmask 457728   ;;  %vm1386_vm14 = vcmask 433152  }
  0x20   : > { %v4423_v62 = vrot.slane %v406_v17, %v667_v16  ;;  %v4425_v6 = vrot.slane %v407_v20, %v667_v16  ;;  %688 = vst.msk [vmem:[#allocation2 + $0x20] sm:$0xff] %vm687_vm8, %v4244_v1  ;;  %vm1550_vm15 = vcmask 408576   ;;  %vm1722_vm3 = vcmask 916480  }
  0x21   : > { %3900 = vmatmul.mubr.msk.f32.gmra.mxu0 %vm413_vm0, %v409_v4  ;;  %vm1886_vm4 = vcmask 891904  }
  0x22   : > { %4031 = vmatprep.mubr.msk.f32.mxu0 %vm4251_vm10, %v4244_v1 }
  0x93   : > { %v4402_v12 = vpop.permute.xlu0 %662 }
  0x94   : > { %v677_v43 = vmul.f32 %v4416_v25, %v4402_v12  ;;  %v678_v9 = vmul.f32 %v4423_v62, %v4402_v12  ;;  %v679_v14 = vmul.f32 %v4425_v6, %v4402_v12 }
  0x97   : > { %v4410_v18 = vpop.permute.xlu0 %716 }
  0x98   : > { %729 = vst.msk [vmem:[#allocation2] sm:$0xf0] %vm728_vm5, %v4410_v18  ;;  %vm2050_vm5 = vcmask 867328  }
  0xdd   : > { %v486_v26 = vpop.f32.mrf.mxu0  ;;  %v4028_v27 = vpop.f32.mrf.mxu1 }
  0xde   : > { %v599_v31 = vmul.f32 %v590_v19, %v486_v26  ;;  %v584_v40 = vmul.f32 %v575_v23, %v486_v26  ;;  %v628_v52 = vmul.f32 %v4028_v27, %v625_v34  ;;  %v646_v53 = vmul.f32 %v4028_v27, %v643_v35 }
  0xdf   : > { %v488_v36 = vpop.f32.mrf.mxu0  ;;  %v563_v37 = vpop.f32.mrf.mxu1 }
  0xe0   : > { %v605_v41 = vrot.slane %v599_v31, 4  ;;  %v600_v42 = vmul.f32 %v594_v24, %v488_v36  ;;  %v585_v44 = vmul.f32 %v579_v28, %v488_v36  ;;  %v586_v45 = vmul.f32 %v583_v29, %v563_v37  ;;  %v1709_v28 = vld [vmem:[#allocation2 + $0x20] sm:$0xff] }
  0xe1   : > { %v601_v46 = vmul.f32 %v598_v30, %v563_v37  ;;  %v492_v47 = vpop.f32.mrf.mxu0  ;;  %v652_v2 = vrot.slane %v646_v53, 4  ;;  %v2213_v29 = vld [vmem:[%s4874_s7] sm:$0xf] }
  0xe2   : > { %v611_v48 = vadd.f32 %v605_v41, %v584_v40  ;;  %v606_v49 = vrot.slane %v600_v42, 4  ;;  %v626_v50 = vmul.f32 %v617_v32, %v492_v47  ;;  %v644_v51 = vmul.f32 %v635_v33, %v492_v47  ;;  %v2204_v30 = vld [vmem:[%s4873_s6] sm:$0xf]  ;;  %v3903_v41 = vld [vmem:[%s4872_s5 + $0x4] sm:$0xf] }
  0xe3   : > { %v607_v54 = vrot.slane %v601_v46, 4  ;;  %v494_v55 = vpop.f32.mrf.mxu0 }
  0xe4   : > { %v612_v56 = vadd.f32 %v606_v49, %v585_v44  ;;  %v629_v57 = vadd.f32 %v626_v50, %v611_v48  ;;  %v650_v58 = vrot.slane %v644_v51, 4  ;;  %v627_v59 = vmul.f32 %v621_v38, %v494_v55  ;;  %v3908_v49 = vld [vmem:[%s4872_s5 + $0x8] sm:$0xf] }
  0xe5   : > { %v613_v60 = vadd.f32 %v607_v54, %v586_v45  ;;  %v645_v61 = vmul.f32 %v639_v39, %v494_v55  ;;  %v734_v45 = vld [vmem:[%s4872_s5] sm:$0xf] }
  0xe6   : > { %v656_v63 = vadd.f32 %v650_v58, %v629_v57  ;;  %v630_v0 = vadd.f32 %v627_v59, %v612_v56 }
  0xe7   : > { %v631_v3 = vadd.f32 %v628_v52, %v613_v60  ;;  %v651_v4 = vrot.slane %v645_v61, 4  ;;  %v3911_v60 = vld [vmem:[%s4872_s5 + $0xc] sm:$0xf] }
  0xe8   : > { %v680_v5 = vadd.f32 %v677_v43, %v656_v63 }
  0xe9   : > { %v657_v7 = vadd.f32 %v651_v4, %v630_v0  ;;  %v658_v13 = vadd.f32 %v652_v2, %v631_v3  ;;  %v3914_v4 = vld [vmem:[%s4872_s5 + $0x10] sm:$0xf] }
  0xea   : > { %692 = vrot.lane.b32.xlu0 %v680_v5, %s4246_s16 }
  0xeb   : > { %v681_v11 = vadd.f32 %v678_v9, %v657_v7  ;;  %v682_v15 = vadd.f32 %v679_v14, %v658_v13  ;;  %v3917_v13 = vld [vmem:[%s4872_s5 + $0x14] sm:$0xf] }
  0xed   : > { %694 = vrot.lane.b32.xlu1 %v681_v11, %s4246_s16 }
  0xee   : > { %720 = vrot.lane.b32.xlu0 %v4177_v10, %s4246_s16 }
  0xf1   : > { %696 = vrot.lane.b32.xlu1 %v682_v15, %s4246_s16 }
  0xf5   : > { %718 = vrot.lane.b32.xlu1 %v4393_v8, %s4246_s16 }
 0x15c   : > { %v693_v16 = vpop.permute.xlu0 %692 }
 0x15d   : > { %705 = vst.msk [vmem:[#allocation2] sm:$0xf] %vm704_vm2, %v693_v16 }
 0x15f   : > { %v695_v17 = vpop.permute.xlu1 %694 }
 0x160   : > { %v698_v12 = vsel %vm683_vm1, %v693_v16, %v695_v17  ;;  %v721_v19 = vpop.permute.xlu0 %720 }
 0x161   : > { %706 = vst [vmem:[#allocation2 + $0x8] sm:$0xf] %v698_v12  ;;  %733 = vst.msk [vmem:[#allocation2 + $0x18] sm:$0xf0] %vm732_vm9, %v721_v19 }
 0x163   : > { %v697_v20 = vpop.permute.xlu1 %696 }
 0x164   : > { %v699_v21 = vsel %vm683_vm1, %v695_v17, %v697_v20  ;;  %709 = vst.msk [vmem:[#allocation2 + $0x18] sm:$0xf] %vm708_vm7, %v697_v20  ;;  %v4444_v8 = vld [vmem:[#allocation2] sm:$0xff]  ;;  %vm2243_vm7 = vcmask 1043456  }
 0x165   : > { %707 = vst [vmem:[#allocation2 + $0x10] sm:$0xf] %v699_v21  ;;  %1214 = vrot.lane.b32.xlu0 %v4444_v8, %s4883_s12  ;;  %745 = vrot.lane.b32.xlu1 %v4444_v8, %s4248_s13  ;;  %vm2251_vm8 = vmor %vm732_vm9, %vm2243_vm7 }
 0x167   : > { %v719_v22 = vpop.permute.xlu1 %718 }
 0x168   : > { %v722_v23 = vsel %vm683_vm1, %v4410_v18, %v719_v22  ;;  %v723_v24 = vsel %vm683_vm1, %v719_v22, %v721_v19 }
 0x169   : > { %730 = vst [vmem:[#allocation2 + $0x8] sm:$0xf0] %v722_v23  ;;  %731 = vst [vmem:[#allocation2 + $0x10] sm:$0xf0] %v723_v24  ;;  %1378 = vrot.lane.b32.xlu0 %v4444_v8, %s4881_s15  ;;  %1050 = vrot.lane.b32.xlu1 %v4444_v8, %s4250_s14 }
 0x16b   : > { %v740_v26 = vld [vmem:[#allocation2 + $0x18] sm:$0xff] }
 0x16d   : > { %1542 = vrot.lane.b32.xlu0 %v4444_v8, %s4879_s22  ;;  %1056 = vrot.lane.b32.xlu1 %v740_v26, %s4250_s14 }
 0x170   : > { %v737_v18 = vld [vmem:[#allocation2 + $0x10] sm:$0xff]  ;;  %v4468_v27 = vld [vmem:[#allocation2 + $0x8] sm:$0xff] }
 0x171   : > { %1220 = vrot.lane.b32.xlu1 %v740_v26, %s4883_s12  ;;  %751 = vrot.lane.b32.xlu0 %v740_v26, %s4248_s13 }
 0x175   : > { %1384 = vrot.lane.b32.xlu1 %v740_v26, %s4881_s15  ;;  %749 = vrot.lane.b32.xlu0 %v737_v18, %s4248_s13 }
 0x179   : > { %1718 = vrot.lane.b32.xlu1 %v740_v26, %s4253_s24  ;;  %1054 = vrot.lane.b32.xlu0 %v737_v18, %s4250_s14 }
 0x17d   : > { %1216 = vrot.lane.b32.xlu0 %v4468_v27, %s4883_s12  ;;  %747 = vrot.lane.b32.xlu1 %v4468_v27, %s4248_s13 }
 0x181   : > { %1380 = vrot.lane.b32.xlu0 %v4468_v27, %s4881_s15  ;;  %1548 = vrot.lane.b32.xlu1 %v740_v26, %s4879_s22 }
 0x185   : > { %1544 = vrot.lane.b32.xlu0 %v4468_v27, %s4879_s22  ;;  %1052 = vrot.lane.b32.xlu1 %v4468_v27, %s4250_s14 }
 0x189   : > { %1716 = vrot.lane.b32.xlu0 %v737_v18, %s4253_s24  ;;  %1218 = vrot.lane.b32.xlu1 %v737_v18, %s4883_s12  ;;  %s4890_s12 = smov 53  }
 0x18d   : > { %1714 = vrot.lane.b32.xlu0 %v4468_v27, %s4253_s24  ;;  %1382 = vrot.lane.b32.xlu1 %v737_v18, %s4881_s15  ;;  %s4891_s15 = smov 50  }
 0x191   : > { %1880 = vrot.lane.b32.xlu0 %v737_v18, %s4254_s25  ;;  %1546 = vrot.lane.b32.xlu1 %v737_v18, %s4879_s22  ;;  %s392_s22 = sand.u32 1, %s4234_s18  }
 0x192   : > { %s4119_s30 = smul.u32 12, %s392_s22 }
 0x195   : > { %1878 = vrot.lane.b32.xlu0 %v4468_v27, %s4254_s25  ;;  %1882 = vrot.lane.b32.xlu1 %v740_v26, %s4254_s25 }
 0x199   : > { %2044 = vrot.lane.b32.xlu0 %v737_v18, %s4255_s29  ;;  %1720 = vrot.lane.b32.xlu1 %v1709_v28, %s4253_s24 }
 0x19d   : > { %2042 = vrot.lane.b32.xlu0 %v4468_v27, %s4255_s29  ;;  %2046 = vrot.lane.b32.xlu1 %v740_v26, %s4255_s29 }
 0x1a1   : > { %2048 = vrot.lane.b32.xlu0 %v1709_v28, %s4255_s29  ;;  %1884 = vrot.lane.b32.xlu1 %v1709_v28, %s4254_s25 }
 0x1a5   : > { %2216 = vperm.xlu0 %4174, %v2213_v29   ;;  %2207 = vperm.xlu1 %4175, %v2204_v30  }
 0x1d7   : > { %v1215_v31 = vpop.permute.xlu0 %1214  ;;  %v746_v32 = vpop.permute.xlu1 %745 }
 0x1db   : > { %v4504_v33 = vpop.permute.xlu0 %1378  ;;  %v1051_v34 = vpop.permute.xlu1 %1050 }
 0x1df   : > { %v4506_v35 = vpop.permute.xlu0 %1542  ;;  %v1057_v36 = vpop.permute.xlu1 %1056 }
 0x1e3   : > { %v752_v37 = vpop.permute.xlu0 %751  ;;  %v1221_v38 = vpop.permute.xlu1 %1220 }
 0x1e7   : > { %v750_v39 = vpop.permute.xlu0 %749  ;;  %v1385_v40 = vpop.permute.xlu1 %1384 }
 0x1e8   : > { %v756_v42 = vsel %vm753_vm11, %v750_v39, %v752_v37 }
 0x1e9   : > { %4030 = vmatpush3.msra.mxu0 %v756_v42 }
 0x1ea   : > { %4032 = vmatmul.mubr.msk.f32.vlgmr.msra.gmra.mxu0 %vm413_vm0, %v3903_v41  ;;  %4034 = vmatprep.subr.mxu0 %v4244_v1 }
 0x1eb   : > { %4035 = vmatpush3.msra.mxu0 %v737_v18  ;;  %v1055_v43 = vpop.permute.xlu0 %1054  ;;  %v4514_v44 = vpop.permute.xlu1 %1718  ;;  %4036 = vmatprep.mubr.msk.f32.mxu0 %vm4251_vm10, %v4244_v1  ;;  %v3923_v18 = vld [vmem:[%s4872_s5 + $0x1c] sm:$0xf] }
 0x1ec   : > { %v1061_v46 = vsel %vm1058_vm12, %v1055_v43, %v1057_v36  ;;  %4039 = vmatprep.subr.mxu0 %v4244_v1 }
 0x1ee   : > { %4037 = vmatmul.mubr.msk.f32.vlgmr.msra.gmra.mxu0 %vm413_vm0, %v734_v45 }
 0x1ef   : > { %4040 = vmatpush3.msra.mxu0 %v1061_v46  ;;  %v1217_v47 = vpop.permute.xlu0 %1216  ;;  %v748_v48 = vpop.permute.xlu1 %747  ;;  %4041 = vmatprep.mubr.msk.f32.mxu0 %vm4251_vm10, %v4244_v1 }
 0x1f0   : > { %v754_v50 = vsel %vm753_vm11, %v746_v32, %v748_v48  ;;  %v755_v51 = vsel %vm753_vm11, %v748_v48, %v750_v39  ;;  %4044 = vmatprep.subr.mxu0 %v4244_v1  ;;  %v1223_v0 = vsel %vm1222_vm13, %v1215_v31, %v1217_v47  ;;  %v3926_v31 = vld [vmem:[%s4872_s5 + $0x20] sm:$0xf] }
 0x1f1   : > { %793 = vmatprep.subr.mxu1 %v755_v51 }
 0x1f2   : > { %794 = vmatpush1.msra.mxu1 %v754_v50  ;;  %4042 = vmatmul.mubr.msk.f32.vlgmr.msra.gmra.mxu0 %vm413_vm0, %v3908_v49 }
 0x1f3   : > { %v1381_v52 = vpop.permute.xlu0 %1380  ;;  %3904 = vmatmul.mubr.msk.f32.vlgmr.msra.gmra.mxu1 %vm413_vm0, %v3903_v41  ;;  %937 = vmatprep.subr.mxu1 %v4468_v27  ;;  %v1549_v53 = vpop.permute.xlu1 %1548 }
 0x1f4   : > { %938 = vmatpush1.msra.mxu1 %v4444_v8  ;;  %971 = vmatprep.mubr.f32.mxu1 %v4244_v1  ;;  %v1387_v9 = vsel %vm1386_vm14, %v4504_v33, %v1381_v52  ;;  %v3920_v8 = vld [vmem:[%s4872_s5 + $0x18] sm:$0xf] }
 0x1f5   : > { %4046 = vmatprep.mubr.msk.f32.mxu0 %vm4251_vm10, %v4244_v1 }
 0x1f7   : > { %v1545_v54 = vpop.permute.xlu0 %1544  ;;  %3906 = vmatmul.mubr.msk.f32.vlgmr.msra.gmra.mxu1 %vm413_vm0, %v734_v45  ;;  %v1053_v55 = vpop.permute.xlu1 %1052 }
 0x1f8   : > { %v1059_v56 = vsel %vm1058_vm12, %v1051_v34, %v1053_v55  ;;  %v1060_v57 = vsel %vm1058_vm12, %v1053_v55, %v1055_v43  ;;  %1132 = vmatprep.mubr.f32.mxu1 %v4244_v1  ;;  %v1551_v16 = vsel %vm1550_vm15, %v4506_v35, %v1545_v54 }
 0x1f9   : > { %1098 = vmatprep.subr.mxu1 %v1060_v57 }
 0x1fa   : > { %1099 = vmatpush1.msra.mxu1 %v1059_v56 }
 0x1fb   : > { %v1717_v58 = vpop.permute.xlu0 %1716  ;;  %3909 = vmatmul.mubr.msk.f32.vlgmr.msra.gmra.mxu1 %vm413_vm0, %v3908_v49  ;;  %v1219_v59 = vpop.permute.xlu1 %1218 }
 0x1fc   : > { %v1225_v61 = vsel %vm1222_vm13, %v1219_v59, %v1221_v38  ;;  %v1224_v63 = vsel %vm1222_vm13, %v1217_v47, %v1219_v59  ;;  %1296 = vmatprep.mubr.f32.mxu1 %v4244_v1  ;;  %v1724_v17 = vsel %vm1722_vm3, %v1717_v58, %v4514_v44 }
 0x1fd   : > { %1262 = vmatprep.subr.mxu1 %v1224_v63  ;;  %4045 = vmatpush3.msra.mxu0 %v1225_v61 }
 0x1fe   : > { %1263 = vmatpush1.msra.mxu1 %v1223_v0  ;;  %4047 = vmatmul.mubr.msk.f32.vlgmr.msra.gmra.mxu0 %vm413_vm0, %v3911_v60 }
 0x1ff   : > { %v1715_v2 = vpop.permute.xlu0 %1714  ;;  %3912 = vmatmul.mubr.msk.f32.vlgmr.msra.gmra.mxu1 %vm413_vm0, %v3911_v60  ;;  %v1383_v3 = vpop.permute.xlu1 %1382  ;;  %4049 = vmatprep.subr.mxu0 %v4244_v1 }
 0x200   : > { %v1389_v5 = vsel %vm1386_vm14, %v1383_v3, %v1385_v40  ;;  %v1388_v7 = vsel %vm1386_vm14, %v1381_v52, %v1383_v3  ;;  %4051 = vmatprep.mubr.msk.f32.mxu0 %vm4251_vm10, %v4244_v1  ;;  %1460 = vmatprep.mubr.f32.mxu1 %v4244_v1  ;;  %v1723_v12 = vsel %vm1722_vm3, %v1715_v2, %v1717_v58 }
 0x201   : > { %1426 = vmatprep.subr.mxu1 %v1388_v7  ;;  %4050 = vmatpush3.msra.mxu0 %v1389_v5 }
 0x202   : > { %1427 = vmatpush1.msra.mxu1 %v1387_v9  ;;  %4052 = vmatmul.mubr.msk.f32.vlgmr.msra.gmra.mxu0 %vm413_vm0, %v3914_v4 }
 0x203   : > { %v1881_v10 = vpop.permute.xlu0 %1880  ;;  %3915 = vmatmul.mubr.msk.f32.vlgmr.msra.gmra.mxu1 %vm413_vm0, %v3914_v4  ;;  %v1547_v11 = vpop.permute.xlu1 %1546  ;;  %4054 = vmatprep.subr.mxu0 %v4244_v1 }
 0x204   : > { %v1553_v14 = vsel %vm1550_vm15, %v1547_v11, %v1549_v53  ;;  %v1552_v15 = vsel %vm1550_vm15, %v1545_v54, %v1547_v11  ;;  %4056 = vmatprep.mubr.msk.f32.mxu0 %vm4251_vm10, %v4244_v1  ;;  %1624 = vmatprep.mubr.f32.mxu1 %v4244_v1 }
 0x205   : > { %1590 = vmatprep.subr.mxu1 %v1552_v15  ;;  %4055 = vmatpush3.msra.mxu0 %v1553_v14 }
 0x206   : > { %1591 = vmatpush1.msra.mxu1 %v1551_v16  ;;  %4057 = vmatmul.mubr.msk.f32.vlgmr.msra.gmra.mxu0 %vm413_vm0, %v3917_v13 }
 0x207   : > { %v1879_v19 = vpop.permute.xlu0 %1878  ;;  %3918 = vmatmul.mubr.msk.f32.vlgmr.msra.gmra.mxu1 %vm413_vm0, %v3917_v13  ;;  %1762 = vmatprep.subr.mxu1 %v1724_v17  ;;  %v1883_v20 = vpop.permute.xlu1 %1882 }
 0x208   : > { %1763 = vmatpush1.msra.mxu1 %v1723_v12  ;;  %v1888_v21 = vsel %vm1886_vm4, %v1881_v10, %v1883_v20  ;;  %1796 = vmatprep.mubr.f32.mxu1 %v4244_v1  ;;  %v1887_v22 = vsel %vm1886_vm4, %v1879_v19, %v1881_v10 }
 0x209   : > { %1926 = vmatprep.subr.mxu1 %v1888_v21  ;;  %4059 = vmatprep.subr.mxu0 %v4244_v1 }
 0x20a   : > { %4061 = vmatprep.mubr.msk.f32.mxu0 %vm4251_vm10, %v4244_v1 }
 0x20b   : > { %v2045_v23 = vpop.permute.xlu0 %2044  ;;  %3921 = vmatmul.mubr.msk.f32.vlgmr.msra.gmra.mxu1 %vm413_vm0, %v3920_v8  ;;  %v1721_v24 = vpop.permute.xlu1 %1720 }
 0x20c   : > { %1927 = vmatpush1.msra.mxu1 %v1887_v22  ;;  %v1725_v26 = vsel %vm1722_vm3, %v4514_v44, %v1721_v24  ;;  %1960 = vmatprep.mubr.f32.mxu1 %v4244_v1 }
 0x20d   : > { %4060 = vmatpush3.msra.mxu0 %v1725_v26 }
 0x20e   : > { %4062 = vmatmul.mubr.msk.f32.vlgmr.msra.gmra.mxu0 %vm413_vm0, %v3920_v8  ;;  %4064 = vmatprep.subr.mxu0 %v4244_v1 }
 0x20f   : > { %v2043_v27 = vpop.permute.xlu0 %2042  ;;  %3924 = vmatmul.mubr.msk.f32.vlgmr.msra.gmra.mxu1 %vm413_vm0, %v3923_v18  ;;  %v2047_v28 = vpop.permute.xlu1 %2046  ;;  %4066 = vmatprep.mubr.msk.f32.mxu0 %vm4251_vm10, %v4244_v1 }
 0x210   : > { %v2051_v29 = vsel %vm2050_vm5, %v2043_v27, %v2045_v23  ;;  %v2052_v30 = vsel %vm2050_vm5, %v2045_v23, %v2047_v28  ;;  %2124 = vmatprep.mubr.f32.mxu1 %v4244_v1 }
 0x211   : > { %2090 = vmatprep.subr.mxu1 %v2052_v30 }
 0x212   : > { %2091 = vmatpush1.msra.mxu1 %v2051_v29 }
 0x213   : > { %v2049_v32 = vpop.permute.xlu0 %2048  ;;  %3927 = vmatmul.mubr.msk.f32.vlgmr.msra.gmra.mxu1 %vm413_vm0, %v3926_v31  ;;  %v1885_v33 = vpop.permute.xlu1 %1884 }
 0x214   : > { %v1889_v34 = vsel %vm1886_vm4, %v1883_v20, %v1885_v33  ;;  %2348 = vmatprep.mubr.f32.mxu1 %v4244_v1  ;;  %v2053_v35 = vsel %vm2050_vm5, %v2047_v28, %v2049_v32 }
 0x215   : > { %4065 = vmatpush3.msra.mxu0 %v1889_v34 }
 0x216   : > { %4067 = vmatmul.mubr.msk.f32.vlgmr.msra.gmra.mxu0 %vm413_vm0, %v3923_v18  ;;  %4069 = vmatprep.subr.mxu0 %v4244_v1 }
 0x217   : > { %4070 = vmatpush3.msra.mxu0 %v2053_v35  ;;  %4071 = vmatprep.mubr.msk.f32.mxu0 %vm4251_vm10, %v4244_v1 }
 0x218   : > { %4074 = vmatprep.subr.mxu0 %v4244_v1 }
 0x21a   : > { %4072 = vmatmul.mubr.msk.f32.vlgmr.msra.gmra.mxu0 %vm413_vm0, %v3926_v31  ;;  %vm2248_vm0 = vcmask 1047556  }
 0x21b   : > { %4076 = vmatprep.mubr.msk.f32.mxu0 %vm4251_vm10, %v4244_v1  ;;  %vm2249_vm6 = vmor %vm2248_vm0, %vm704_vm2 }
 0x220   : > { %v2208_v24 = vpop.permute.xlu1 %2207  ;;  %v2217_v32 = vpop.permute.xlu0 %2216 }
 0x2aa   : > { %v900_v36 = vpop.f32.mrf.mxu0 }
 0x2ac   : > { %v4033_v37 = vpop.f32.mrf.mxu0 }
 0x2ae   : > { %v1044_v38 = vpop.f32.mrf.mxu0 }
 0x2af   : > { %v1045_v63 = vadd.f32 %v1044_v38, %v900_v36 }
 0x2b0   : > { %v4038_v39 = vpop.f32.mrf.mxu0 }
 0x2b2   : > { %v1205_v40 = vpop.f32.mrf.mxu0 }
 0x2b3   : > { %v829_v41 = vpop.f32.mrf.mxu1  ;;  %v1211_v9 = vadd.f32 %v1205_v40, %v1045_v63 }
 0x2b4   : > { %v4043_v42 = vpop.f32.mrf.mxu0 }
 0x2b5   : > { %v831_v43 = vpop.f32.mrf.mxu1 }
 0x2b7   : > { %v973_v44 = vpop.f32.mrf.mxu1 }
 0x2b8   : > { %v974_v56 = vadd.f32 %v973_v44, %v829_v41 }
 0x2b9   : > { %v975_v45 = vpop.f32.mrf.mxu1 }
 0x2ba   : > { %v976_v59 = vadd.f32 %v975_v45, %v831_v43 }
 0x2bb   : > { %v1134_v46 = vpop.f32.mrf.mxu1 }
 0x2bc   : > { %v1209_v60 = vadd.f32 %v1134_v46, %v974_v56 }
 0x2bd   : > { %v1136_v47 = vpop.f32.mrf.mxu1 }
 0x2be   : > { %v1369_v48 = vpop.f32.mrf.mxu0  ;;  %v1210_v2 = vadd.f32 %v1136_v47, %v976_v59 }
 0x2bf   : > { %v1298_v49 = vpop.f32.mrf.mxu1  ;;  %v1375_v19 = vadd.f32 %v1369_v48, %v1211_v9 }
 0x2c0   : > { %v4048_v50 = vpop.f32.mrf.mxu0  ;;  %v1373_v3 = vadd.f32 %v1298_v49, %v1209_v60 }
 0x2c1   : > { %v1300_v51 = vpop.f32.mrf.mxu1 }
 0x2c2   : > { %v1533_v52 = vpop.f32.mrf.mxu0  ;;  %v1374_v5 = vadd.f32 %v1300_v51, %v1210_v2  ;;  %v3789_v2 = vld [vmem:[%s4877_s10] sm:$0xf] }
 0x2c3   : > { %v1462_v53 = vpop.f32.mrf.mxu1  ;;  %v1539_v22 = vadd.f32 %v1533_v52, %v1375_v19  ;;  %v3929_v19 = vld [vmem:[%s4875_s8 + $0x4] sm:$0xf] }
 0x2c4   : > { %v4053_v54 = vpop.f32.mrf.mxu0  ;;  %v1537_v7 = vadd.f32 %v1462_v53, %v1373_v3 }
 0x2c5   : > { %v1464_v55 = vpop.f32.mrf.mxu1 }
 0x2c6   : > { %v1697_v57 = vpop.f32.mrf.mxu0  ;;  %v1538_v11 = vadd.f32 %v1464_v55, %v1374_v5 }
 0x2c7   : > { %v1626_v58 = vpop.f32.mrf.mxu1  ;;  %v1703_v27 = vadd.f32 %v1697_v57, %v1539_v22 }
 0x2c8   : > { %v4058_v61 = vpop.f32.mrf.mxu0  ;;  %v1701_v13 = vadd.f32 %v1626_v58, %v1537_v7 }
 0x2c9   : > { %v1628_v0 = vpop.f32.mrf.mxu1 }
 0x2ca   : > { %v1702_v16 = vadd.f32 %v1628_v0, %v1538_v11  ;;  %v3780_v0 = vld [vmem:[%s4876_s9] sm:$0xf] }
 0x2cb   : > { %v1798_v4 = vpop.f32.mrf.mxu1 }
 0x2cc   : > { %v1873_v17 = vadd.f32 %v1798_v4, %v1701_v13 }
 0x2cd   : > { %v1800_v10 = vpop.f32.mrf.mxu1 }
 0x2ce   : > { %v1869_v14 = vpop.f32.mrf.mxu0  ;;  %v1874_v21 = vadd.f32 %v1800_v10, %v1702_v16 }
 0x2cf   : > { %v1962_v15 = vpop.f32.mrf.mxu1  ;;  %v1875_v33 = vadd.f32 %v1869_v14, %v1703_v27 }
 0x2d0   : > { %v4063_v12 = vpop.f32.mrf.mxu0  ;;  %v2037_v8 = vadd.f32 %v1962_v15, %v1873_v17 }
 0x2d1   : > { %v1964_v20 = vpop.f32.mrf.mxu1 }
 0x2d2   : > { %v2038_v26 = vadd.f32 %v1964_v20, %v1874_v21 }
 0x2d3   : > { %v2126_v23 = vpop.f32.mrf.mxu1 }
 0x2d4   : > { %v2201_v18 = vadd.f32 %v2126_v23, %v2037_v8 }
 0x2d5   : > { %v2128_v28 = vpop.f32.mrf.mxu1 }
 0x2d6   : > { %v2202_v29 = vadd.f32 %v2128_v28, %v2038_v26  ;;  %v2210_v30 = vmul.f32 %v2208_v24, %v2201_v18  ;;  %v2033_v31 = vpop.f32.mrf.mxu0  ;;  %v2253_v26 = vld [vmem:[%s4875_s8] sm:$0xf] }
 0x2d7   : > { %v2039_v37 = vadd.f32 %v2033_v31, %v1875_v33  ;;  %v3940_v31 = vld [vmem:[%s4875_s8 + $0x8] sm:$0xf] }
 0x2d8   : > { %v2211_v34 = vmul.f32 %v2208_v24, %v2202_v29  ;;  %v2219_v35 = vadd.f32 %v2217_v32, %v2210_v30  ;;  %v4068_v36 = vpop.f32.mrf.mxu0 }
 0x2da   : > { %v2220_v38 = vadd.f32 %v2217_v32, %v2211_v34  ;;  %v2222_v39 = vmax.f32 %v2219_v35, 0.0  ;;  %v2197_v40 = vpop.f32.mrf.mxu0 }
 0x2db   : > { %v2203_v41 = vadd.f32 %v2197_v40, %v2039_v37  ;;  %v3946_v37 = vld [vmem:[%s4875_s8 + $0xc] sm:$0xf] }
 0x2dc   : > { %v2223_v42 = vmax.f32 %v2220_v38, 0.0  ;;  %v4073_v43 = vpop.f32.mrf.mxu0  ;;  %v2225_v45 = vmul.f32 %v2222_v39, %v4416_v25 }
 0x2dd   : > { %v2212_v44 = vmul.f32 %v2208_v24, %v2203_v41  ;;  %v3952_v43 = vld [vmem:[%s4875_s8 + $0x10] sm:$0xf] }
 0x2de   : > { %v2226_v46 = vmul.f32 %v2223_v42, %v4423_v62 }
 0x2df   : > { %v2221_v47 = vadd.f32 %v2217_v32, %v2212_v44 }
 0x2e0   : > { %v2235_v48 = vcombine.low %v2225_v45, %v2226_v46 }
 0x2e1   : > { %v2224_v49 = vmax.f32 %v2221_v47, 0.0 }
 0x2e2   : > { %2236 = vrot.lane.b32.xlu1 %v2235_v48, %s4246_s16 }
 0x2e3   : > { %v2227_v50 = vmul.f32 %v2224_v49, %v4425_v6  ;;  %v3958_v49 = vld [vmem:[%s4875_s8 + $0x14] sm:$0xf] }
 0x2e5   : > { %2238 = vrot.lane.b32.xlu0 %v2227_v50, %s4246_s16  ;;  %s4889_s16 = smov 56  }
 0x354   : > { %v2237_v51 = vpop.permute.xlu1 %2236 }
 0x355   : > { %v2240_v52 = vrot.slane %v2237_v51, 4 }
 0x357   : > { %v2242_v53 = vsel %vm683_vm1, %v2240_v52, %v2237_v51  ;;  %v2239_v25 = vpop.permute.xlu0 %2238 }
 0x358   : > { %2250 = vst.msk [vmem:[#allocation3] sm:$0xff] %vm2249_vm6, %v2242_v53  ;;  %v2241_v62 = vrot.slane %v2239_v25, 4 }
 0x35a   : > { %v2244_v54 = vsel %vm2243_vm7, %v2240_v52, %v2241_v62  ;;  %v3964_v62 = vld [vmem:[%s4875_s8 + $0x18] sm:$0xf] }
 0x35b   : > { %v2245_v6 = vsel %vm683_vm1, %v2244_v54, %v2239_v25  ;;  %vm2274_vm1 = vcmask 31744  }
 0x35c   : > { %2252 = vst.msk [vmem:[#allocation3 + $0x8] sm:$0xff] %vm2251_vm8, %v2245_v6 }
 0x35f   : > { %v4632_v55 = vld [vmem:[#allocation3] sm:$0xff] }
 0x360   : > { %2263 = vrot.lane.b32.xlu1 %v4632_v55, %s4248_s13  ;;  %v4644_v57 = vcombine.high %v4632_v55, %v4632_v55 }
 0x363   : > { %v2258_v56 = vld [vmem:[#allocation3 + $0x8] sm:$0xff] }
 0x364   : > { %2267 = vrot.lane.b32.xlu0 %v2258_v56, %s4248_s13  ;;  %2584 = vrot.lane.b32.xlu1 %v4632_v55, %s4250_s14  ;;  %v2262_v58 = vcombine.high %v2258_v56, %v2258_v56  ;;  %v3266_v59 = vld [vmem:[#allocation3 + $0x4] sm:$0xff]  ;;  %v3267_v61 = vld [vmem:[#allocation3 + $0xc] sm:$0xff] }
 0x365   : > { %v3270_v60 = vcombine.high %v3266_v59, %v3266_v59  ;;  %v3271_v63 = vcombine.high %v3267_v61, %v3267_v61  ;;  %v2255_v22 = vld [vmem:[#allocation3 + $0x8] sm:$0xf] }
 0x368   : > { %2588 = vrot.lane.b32.xlu0 %v2258_v56, %s4250_s14  ;;  %2756 = vrot.lane.b32.xlu1 %v4632_v55, %s4889_s16 }
 0x36c   : > { %2758 = vrot.lane.b32.xlu0 %v4644_v57, %s4889_s16  ;;  %2928 = vrot.lane.b32.xlu1 %v4632_v55, %s4890_s12 }
 0x370   : > { %2930 = vrot.lane.b32.xlu0 %v4644_v57, %s4890_s12  ;;  %2760 = vrot.lane.b32.xlu1 %v2258_v56, %s4889_s16 }
 0x374   : > { %3102 = vrot.lane.b32.xlu0 %v4644_v57, %s4891_s15  ;;  %2932 = vrot.lane.b32.xlu1 %v2258_v56, %s4890_s12 }
 0x378   : > { %2269 = vrot.lane.b32.xlu0 %v2262_v58, %s4248_s13  ;;  %2265 = vrot.lane.b32.xlu1 %v4644_v57, %s4248_s13  ;;  %s3808_s13 = scalar_lea.sflag [#allocation5], %s392_s22 }
 0x37c   : > { %2590 = vrot.lane.b32.xlu0 %v2262_v58, %s4250_s14  ;;  %3104 = vrot.lane.b32.xlu1 %v2258_v56, %s4891_s15 }
 0x380   : > { %2762 = vrot.lane.b32.xlu0 %v2262_v58, %s4889_s16  ;;  %2586 = vrot.lane.b32.xlu1 %v4644_v57, %s4250_s14 }
 0x384   : > { %2934 = vrot.lane.b32.xlu0 %v2262_v58, %s4890_s12  ;;  %3100 = vrot.lane.b32.xlu1 %v4632_v55, %s4891_s15 }
 0x388   : > { %3274 = vrot.lane.b32.xlu0 %v3270_v60, %s4253_s24  ;;  %3276 = vrot.lane.b32.xlu1 %v3267_v61, %s4253_s24 }
 0x38c   : > { %3106 = vrot.lane.b32.xlu0 %v2262_v58, %s4891_s15  ;;  %3272 = vrot.lane.b32.xlu1 %v3266_v59, %s4253_s24 }
 0x390   : > { %3446 = vrot.lane.b32.xlu0 %v3270_v60, %s4254_s25  ;;  %3448 = vrot.lane.b32.xlu1 %v3267_v61, %s4254_s25 }
 0x394   : > { %3278 = vrot.lane.b32.xlu0 %v3271_v63, %s4253_s24  ;;  %3444 = vrot.lane.b32.xlu1 %v3266_v59, %s4254_s25  ;;  %s4122_s24 = smul.u32 192, %s4338_s21  ;;  %s4256_s21 = smov [#allocation4]  }
 0x396   : > { %s4830_s15 = scalar_lea.hbm %s4878_s11, %s4122_s24 }
 0x398   : > { %3618 = vrot.lane.b32.xlu0 %v3270_v60, %s4255_s29  ;;  %3620 = vrot.lane.b32.xlu1 %v3267_v61, %s4255_s29 }
 0x39c   : > { %3450 = vrot.lane.b32.xlu0 %v3271_v63, %s4254_s25  ;;  %3616 = vrot.lane.b32.xlu1 %v3266_v59, %s4255_s29  ;;  %s394_s25 = scalar_lea.vmem [#allocation4], %s4119_s30  ;;  %s4186_s30 = sshll.u32 %s4256_s21, 4  ;;  %s4187_s30 = int_to_ptr.vmem [resolvable:$false] %s4186_s30 }
 0x39d   : > { %s4188_s0 = scalar_lea.vmem %s4187_s30, 384 }
 0x3a0   : > { %3622 = vrot.lane.b32.xlu0 %v3271_v63, %s4255_s29  ;;  %3783 = vperm.xlu1 %4175, %v3780_v0   ;;  %v3976_v0 = vld [vmem:[%s4875_s8 + $0x20] sm:$0xf]  ;;  %s3822_s29 = sshll.u32 %s394_s25, 4  ;;  %s3823_s29 = int_to_ptr.vmem [resolvable:$true] %s3822_s29 }
 0x3a1   : > { %s4182_s14 = scalar_lea.vmem %s3823_s29, 192  ;;  %p4189_p0 = scmp.lt.s32.totalorder %s3823_s29, %s4187_s30 }
 0x3a2   : > { %p4183_p11 = scmp.ne.s32.totalorder %s3823_s29, %s4182_s14  ;;  %p4190_p1 = scmp.lt.s32.totalorder %s4188_s0, %s4182_s14 }
 0x3a4   : > { %3792 = vperm.xlu0 %4174, %v3789_v2   ;;  %p4184_p12 = pnand %p4183_p11, %p4355_p5  ;;  %p4191_p2 = por %p4190_p1, %p4189_p0 }
 0x3a6   : > { %p4185_p13 = pneg %p4184_p12 }
 0x3a8   : > { %p4192_p3 = pnand %p4191_p2, %p4185_p13 }
 0x3d2   : > { %v2264_v3 = vpop.permute.xlu1 %2263 }
 0x3d6   : > { %v2268_v4 = vpop.permute.xlu0 %2267  ;;  %v2585_v5 = vpop.permute.xlu1 %2584 }
 0x3da   : > { %v2589_v7 = vpop.permute.xlu0 %2588  ;;  %v2757_v9 = vpop.permute.xlu1 %2756 }
 0x3de   : > { %v2759_v10 = vpop.permute.xlu0 %2758  ;;  %v4686_v11 = vpop.permute.xlu1 %2928 }
 0x3df   : > { %v2764_v36 = vsel %vm1222_vm13, %v2757_v9, %v2759_v10 }
 0x3e2   : > { %v2931_v13 = vpop.permute.xlu0 %2930  ;;  %v2761_v14 = vpop.permute.xlu1 %2760 }
 0x3e3   : > { %v2765_v33 = vsel %vm1222_vm13, %v2759_v10, %v2761_v14  ;;  %v2936_v42 = vsel %vm1386_vm14, %v4686_v11, %v2931_v13 }
 0x3e6   : > { %v4688_v15 = vpop.permute.xlu0 %3102  ;;  %v2933_v16 = vpop.permute.xlu1 %2932 }
 0x3e7   : > { %v2937_v38 = vsel %vm1386_vm14, %v2931_v13, %v2933_v16 }
 0x3ea   : > { %v2270_v17 = vpop.permute.xlu0 %2269  ;;  %v2266_v12 = vpop.permute.xlu1 %2265 }
 0x3eb   : > { %v2273_v20 = vsel %vm753_vm11, %v2268_v4, %v2270_v17  ;;  %v2271_v21 = vsel %vm753_vm11, %v2264_v3, %v2266_v12  ;;  %v2272_v8 = vsel %vm753_vm11, %v2266_v12, %v2268_v4 }
 0x3ec   : > { %3930 = vmatprep.subr.msk.mxu1 %vm2243_vm7, %v2272_v8  ;;  %4075 = vmatpush3.msk.msra.mxu0 %vm2243_vm7, %v2273_v20 }
 0x3ed   : > { %3931 = vmatpush1.msk.msra.mxu1 %vm2243_vm7, %v2271_v21  ;;  %4077 = vmatmul.mubr.msk.f32.vlgmr.msra.gmra.mxu0 %vm2274_vm1, %v3929_v19 }
 0x3ee   : > { %4079 = vmatprep.subr.mxu0 %v4244_v1  ;;  %v2591_v23 = vpop.permute.xlu0 %2590  ;;  %3932 = vmatmul.mubr.msk.f32.vlgmr.msra.gmra.mxu1 %vm2274_vm1, %v3929_v19  ;;  %v3105_v24 = vpop.permute.xlu1 %3104 }
 0x3ef   : > { %4080 = vmatpush3.msk.msra.mxu0 %vm2243_vm7, %v2255_v22  ;;  %3935 = vmatprep.subr.msk.mxu1 %vm2243_vm7, %v4644_v57  ;;  %v2594_v18 = vsel %vm1058_vm12, %v2589_v7, %v2591_v23  ;;  %v3109_v44 = vsel %vm1550_vm15, %v4688_v15, %v3105_v24  ;;  %v3970_v57 = vld [vmem:[%s4875_s8 + $0x1c] sm:$0xf] }
 0x3f0   : > { %3936 = vmatpush1.msk.msra.mxu1 %vm2243_vm7, %v4632_v55  ;;  %4081 = vmatprep.mubr.msk.f32.mxu0 %vm4251_vm10, %v4244_v1 }
 0x3f1   : > { %4084 = vmatprep.subr.mxu0 %v4244_v1  ;;  %2499 = vmatprep.mubr.f32.mxu1 %v4244_v1 }
 0x3f2   : > { %4082 = vmatmul.mubr.msk.f32.vlgmr.msra.gmra.mxu0 %vm2274_vm1, %v2253_v26  ;;  %v2763_v27 = vpop.permute.xlu0 %2762  ;;  %3937 = vmatmul.mubr.msk.f32.vlgmr.msra.gmra.mxu1 %vm2274_vm1, %v2253_v26  ;;  %v2587_v28 = vpop.permute.xlu1 %2586 }
 0x3f3   : > { %4085 = vmatpush3.msk.msra.mxu0 %vm2243_vm7, %v2594_v18  ;;  %v2592_v29 = vsel %vm1058_vm12, %v2585_v5, %v2587_v28  ;;  %v2593_v30 = vsel %vm1058_vm12, %v2587_v28, %v2589_v7  ;;  %4086 = vmatprep.mubr.msk.f32.mxu0 %vm4251_vm10, %v4244_v1  ;;  %v2766_v32 = vsel %vm1222_vm13, %v2761_v14, %v2763_v27 }
 0x3f4   : > { %3941 = vmatprep.subr.msk.mxu1 %vm2243_vm7, %v2593_v30  ;;  %4089 = vmatprep.subr.mxu0 %v4244_v1 }
 0x3f5   : > { %3942 = vmatpush1.msk.msra.mxu1 %vm2243_vm7, %v2592_v29  ;;  %2668 = vmatprep.mubr.f32.mxu1 %v4244_v1 }
 0x3f6   : > { %4087 = vmatmul.mubr.msk.f32.vlgmr.msra.gmra.mxu0 %vm2274_vm1, %v3940_v31  ;;  %v2935_v34 = vpop.permute.xlu0 %2934  ;;  %3943 = vmatmul.mubr.msk.f32.vlgmr.msra.gmra.mxu1 %vm2274_vm1, %v3940_v31  ;;  %v3101_v35 = vpop.permute.xlu1 %3100 }
 0x3f7   : > { %4090 = vmatpush3.msk.msra.mxu0 %vm2243_vm7, %v2766_v32  ;;  %3947 = vmatprep.subr.msk.mxu1 %vm2243_vm7, %v2765_v33  ;;  %v2938_v39 = vsel %vm1386_vm14, %v2933_v16, %v2935_v34  ;;  %v3108_v47 = vsel %vm1550_vm15, %v3101_v35, %v4688_v15 }
 0x3f8   : > { %3948 = vmatpush1.msk.msra.mxu1 %vm2243_vm7, %v2764_v36  ;;  %4091 = vmatprep.mubr.msk.f32.mxu0 %vm4251_vm10, %v4244_v1 }
 0x3f9   : > { %3953 = vmatprep.subr.msk.mxu1 %vm2243_vm7, %v2937_v38  ;;  %4094 = vmatprep.subr.mxu0 %v4244_v1 }
 0x3fa   : > { %2840 = vmatprep.mubr.f32.mxu1 %v4244_v1  ;;  %4092 = vmatmul.mubr.msk.f32.vlgmr.msra.gmra.mxu0 %vm2274_vm1, %v3946_v37  ;;  %v3275_v40 = vpop.permute.xlu0 %3274  ;;  %v3277_v41 = vpop.permute.xlu1 %3276 }
 0x3fb   : > { %4095 = vmatpush3.msk.msra.mxu0 %vm2243_vm7, %v2938_v39  ;;  %3949 = vmatmul.mubr.msk.f32.vlgmr.msra.gmra.mxu1 %vm2274_vm1, %v3946_v37  ;;  %v3281_v50 = vsel %vm1722_vm3, %v3275_v40, %v3277_v41 }
 0x3fc   : > { %3954 = vmatpush1.msk.msra.mxu1 %vm2243_vm7, %v2936_v42  ;;  %4096 = vmatprep.mubr.msk.f32.mxu0 %vm4251_vm10, %v4244_v1 }
 0x3fd   : > { %3959 = vmatprep.subr.msk.mxu1 %vm2243_vm7, %v3109_v44  ;;  %3012 = vmatprep.mubr.f32.mxu1 %v4244_v1 }
 0x3fe   : > { %4097 = vmatmul.mubr.msk.f32.vlgmr.msra.gmra.mxu0 %vm2274_vm1, %v3952_v43  ;;  %v3107_v45 = vpop.permute.xlu0 %3106  ;;  %v3273_v46 = vpop.permute.xlu1 %3272  ;;  %4099 = vmatprep.subr.mxu0 %v4244_v1 }
 0x3ff   : > { %v3110_v48 = vsel %vm1550_vm15, %v3105_v24, %v3107_v45  ;;  %3955 = vmatmul.mubr.msk.f32.vlgmr.msra.gmra.mxu1 %vm2274_vm1, %v3952_v43  ;;  %4101 = vmatprep.mubr.msk.f32.mxu0 %vm4251_vm10, %v4244_v1  ;;  %v3280_v53 = vsel %vm1722_vm3, %v3273_v46, %v3275_v40 }
 0x400   : > { %3960 = vmatpush1.msk.msra.mxu1 %vm2243_vm7, %v3108_v47  ;;  %4100 = vmatpush3.msk.msra.mxu0 %vm2243_vm7, %v3110_v48 }
 0x401   : > { %3965 = vmatprep.subr.msk.mxu1 %vm2243_vm7, %v3281_v50  ;;  %3184 = vmatprep.mubr.f32.mxu1 %v4244_v1 }
 0x402   : > { %4102 = vmatmul.mubr.msk.f32.vlgmr.msra.gmra.mxu0 %vm2274_vm1, %v3958_v49  ;;  %v3447_v51 = vpop.permute.xlu0 %3446  ;;  %v3449_v52 = vpop.permute.xlu1 %3448  ;;  %4104 = vmatprep.subr.mxu0 %v4244_v1 }
 0x403   : > { %3961 = vmatmul.mubr.msk.f32.vlgmr.msra.gmra.mxu1 %vm2274_vm1, %v3958_v49  ;;  %v3453_v25 = vsel %vm1886_vm4, %v3447_v51, %v3449_v52  ;;  %4106 = vmatprep.mubr.msk.f32.mxu0 %vm4251_vm10, %v4244_v1 }
 0x404   : > { %3966 = vmatpush1.msk.msra.mxu1 %vm2243_vm7, %v3280_v53  ;;  %3356 = vmatprep.mubr.f32.mxu1 %v4244_v1 }
 0x405   : > { %3971 = vmatprep.subr.msk.mxu1 %vm2243_vm7, %v3453_v25 }
 0x406   : > { %v3279_v54 = vpop.permute.xlu0 %3278  ;;  %v3445_v6 = vpop.permute.xlu1 %3444 }
 0x407   : > { %v3282_v55 = vsel %vm1722_vm3, %v3277_v41, %v3279_v54  ;;  %3967 = vmatmul.mubr.msk.f32.vlgmr.msra.gmra.mxu1 %vm2274_vm1, %v3964_v62  ;;  %v3452_v56 = vsel %vm1886_vm4, %v3445_v6, %v3447_v51 }
 0x408   : > { %4105 = vmatpush3.msk.msra.mxu0 %vm2243_vm7, %v3282_v55  ;;  %3972 = vmatpush1.msk.msra.mxu1 %vm2243_vm7, %v3452_v56 }
 0x409   : > { %4107 = vmatmul.mubr.msk.f32.vlgmr.msra.gmra.mxu0 %vm2274_vm1, %v3964_v62  ;;  %3528 = vmatprep.mubr.f32.mxu1 %v4244_v1 }
 0x40a   : > { %v3619_v58 = vpop.permute.xlu0 %3618  ;;  %v3621_v59 = vpop.permute.xlu1 %3620  ;;  %4109 = vmatprep.subr.mxu0 %v4244_v1  ;;  %4111 = vmatprep.mubr.msk.f32.mxu0 %vm4251_vm10, %v4244_v1 }
 0x40b   : > { %3973 = vmatmul.mubr.msk.f32.vlgmr.msra.gmra.mxu1 %vm2274_vm1, %v3970_v57  ;;  %v3625_v60 = vsel %vm2050_vm5, %v3619_v58, %v3621_v59 }
 0x40c   : > { %3977 = vmatprep.subr.msk.mxu1 %vm2243_vm7, %v3625_v60  ;;  %3700 = vmatprep.mubr.f32.mxu1 %v4244_v1 }
 0x40e   : > { %v3451_v61 = vpop.permute.xlu0 %3450  ;;  %v3617_v63 = vpop.permute.xlu1 %3616 }
 0x40f   : > { %v3454_v2 = vsel %vm1886_vm4, %v3449_v52, %v3451_v61  ;;  %v3624_v3 = vsel %vm2050_vm5, %v3617_v63, %v3619_v58 }
 0x410   : > { %4110 = vmatpush3.msk.msra.mxu0 %vm2243_vm7, %v3454_v2  ;;  %3978 = vmatpush1.msk.msra.mxu1 %vm2243_vm7, %v3624_v3 }
 0x411   : > { %4112 = vmatmul.mubr.msk.f32.vlgmr.msra.gmra.mxu0 %vm2274_vm1, %v3970_v57  ;;  %3979 = vmatmul.mubr.msk.f32.vlgmr.msra.gmra.mxu1 %vm2274_vm1, %v3976_v0 }
 0x412   : > { %v3623_v4 = vpop.permute.xlu0 %3622  ;;  %4114 = vmatprep.subr.mxu0 %v4244_v1  ;;  %4116 = vmatprep.mubr.msk.f32.mxu0 %vm4251_vm10, %v4244_v1 }
 0x413   : > { %v3626_v5 = vsel %vm2050_vm5, %v3621_v59, %v3623_v4 }
 0x414   : > { %4115 = vmatpush3.msk.msra.mxu0 %vm2243_vm7, %v3626_v5 }
 0x415   : > { %4117 = vmatmul.mubr.msk.f32.vlgmr.msra.gmra.mxu0 %vm2274_vm1, %v3976_v0 }
 0x41b   : > { %v3784_v6 = vpop.permute.xlu1 %3783 }
 0x41f   : > { %v3793_v0 = vpop.permute.xlu0 %3792 }
 0x4ad   : > { %v2421_v7 = vpop.f32.mrf.mxu0 }
 0x4ae   : > { %v2350_v9 = vpop.f32.mrf.mxu1 }
 0x4af   : > { %v4078_v10 = vpop.f32.mrf.mxu0 }
 0x4b0   : > { %v2352_v11 = vpop.f32.mrf.mxu1 }
 0x4b2   : > { %v2572_v13 = vpop.f32.mrf.mxu0  ;;  %v2501_v14 = vpop.f32.mrf.mxu1 }
 0x4b3   : > { %v2573_v29 = vadd.f32 %v2572_v13, %v2421_v7  ;;  %v2502_v30 = vadd.f32 %v2501_v14, %v2350_v9 }
 0x4b4   : > { %v4083_v15 = vpop.f32.mrf.mxu0  ;;  %v2503_v16 = vpop.f32.mrf.mxu1 }
 0x4b5   : > { %v2504_v33 = vadd.f32 %v2503_v16, %v2352_v11 }
 0x4b6   : > { %v2741_v17 = vpop.f32.mrf.mxu0  ;;  %v2670_v12 = vpop.f32.mrf.mxu1 }
 0x4b7   : > { %v2745_v34 = vadd.f32 %v2670_v12, %v2502_v30  ;;  %v2747_v36 = vadd.f32 %v2741_v17, %v2573_v29 }
 0x4b8   : > { %v4088_v19 = vpop.f32.mrf.mxu0  ;;  %v2672_v20 = vpop.f32.mrf.mxu1 }
 0x4b9   : > { %v2746_v37 = vadd.f32 %v2672_v20, %v2504_v33 }
 0x4ba   : > { %v2913_v21 = vpop.f32.mrf.mxu0 }
 0x4bb   : > { %v2842_v1 = vpop.f32.mrf.mxu1  ;;  %v2919_v45 = vadd.f32 %v2913_v21, %v2747_v36 }
 0x4bc   : > { %v4093_v8 = vpop.f32.mrf.mxu0  ;;  %v2917_v38 = vadd.f32 %v2842_v1, %v2745_v34 }
 0x4bd   : > { %v2844_v22 = vpop.f32.mrf.mxu1 }
 0x4be   : > { %v3085_v23 = vpop.f32.mrf.mxu0  ;;  %v2918_v41 = vadd.f32 %v2844_v22, %v2746_v37 }
 0x4bf   : > { %v3014_v24 = vpop.f32.mrf.mxu1  ;;  %v3091_v48 = vadd.f32 %v3085_v23, %v2919_v45 }
 0x4c0   : > { %v4098_v26 = vpop.f32.mrf.mxu0  ;;  %v3089_v42 = vadd.f32 %v3014_v24, %v2917_v38 }
 0x4c1   : > { %v3016_v18 = vpop.f32.mrf.mxu1 }
 0x4c2   : > { %v3257_v27 = vpop.f32.mrf.mxu0  ;;  %v3090_v46 = vadd.f32 %v3016_v18, %v2918_v41 }
 0x4c3   : > { %v3186_v28 = vpop.f32.mrf.mxu1  ;;  %v3263_v52 = vadd.f32 %v3257_v27, %v3091_v48 }
 0x4c4   : > { %v4103_v31 = vpop.f32.mrf.mxu0  ;;  %v3261_v47 = vadd.f32 %v3186_v28, %v3089_v42 }
 0x4c5   : > { %v3188_v32 = vpop.f32.mrf.mxu1 }
 0x4c6   : > { %v3262_v49 = vadd.f32 %v3188_v32, %v3090_v46 }
 0x4c7   : > { %v3358_v35 = vpop.f32.mrf.mxu1 }
 0x4c8   : > { %v3433_v50 = vadd.f32 %v3358_v35, %v3261_v47 }
 0x4c9   : > { %v3360_v39 = vpop.f32.mrf.mxu1  ;;  %v3429_v40 = vpop.f32.mrf.mxu0 }
 0x4ca   : > { %v3434_v53 = vadd.f32 %v3360_v39, %v3262_v49  ;;  %v3435_v55 = vadd.f32 %v3429_v40, %v3263_v52 }
 0x4cb   : > { %v3530_v43 = vpop.f32.mrf.mxu1  ;;  %v4108_v44 = vpop.f32.mrf.mxu0 }
 0x4cc   : > { %v3605_v25 = vadd.f32 %v3530_v43, %v3433_v50 }
 0x4cd   : > { %v3532_v51 = vpop.f32.mrf.mxu1 }
 0x4ce   : > { %v3606_v56 = vadd.f32 %v3532_v51, %v3434_v53 }
 0x4d1   : > { %v3601_v62 = vpop.f32.mrf.mxu0  ;;  %v3702_v54 = vpop.f32.mrf.mxu1 }
 0x4d2   : > { %v3777_v57 = vadd.f32 %v3702_v54, %v3605_v25  ;;  %v3607_v60 = vadd.f32 %v3601_v62, %v3435_v55 }
 0x4d3   : > { %v4113_v58 = vpop.f32.mrf.mxu0  ;;  %v3704_v59 = vpop.f32.mrf.mxu1 }
 0x4d4   : > { %v3786_v61 = vmul.f32 %v3784_v6, %v3777_v57  ;;  %v3778_v63 = vadd.f32 %v3704_v59, %v3606_v56 }
 0x4d5   : > { %v3773_v2 = vpop.f32.mrf.mxu0 }
 0x4d6   : > { %v3795_v3 = vadd.f32 %v3793_v0, %v3786_v61  ;;  %v3787_v4 = vmul.f32 %v3784_v6, %v3778_v63  ;;  %v3779_v5 = vadd.f32 %v3773_v2, %v3607_v60 }
 0x4d7   : > { %v4118_v7 = vpop.f32.mrf.mxu0 }
 0x4d8   : > { %v3796_v9 = vadd.f32 %v3793_v0, %v3787_v4  ;;  %v3788_v10 = vmul.f32 %v3784_v6, %v3779_v5  ;;  %v3798_v11 = vmax.f32 %v3795_v3, 0.0 }
 0x4da   : > { %v3799_v13 = vmax.f32 %v3796_v9, 0.0  ;;  %v3797_v14 = vadd.f32 %v3793_v0, %v3788_v10 }
 0x4dc   : > { %v3803_v15 = vcombine.low %v3798_v11, %v3799_v13  ;;  %v3800_v16 = vmax.f32 %v3797_v14, 0.0 }
 0x4de   : > { %3805 = vst [vmem:[%s394_s25] sm:$0xff] %v3803_v15  ;;  %3806 = vst [vmem:[%s394_s25 + $0x8] sm:$0xf] %v3800_v16 }
 0x4df   : > { %4195 = shalt.err (!%p4192_p3)
}
 0x4e0   : > { %s4196_s24 = scalar_lea.hbm %s4830_s15, 192  ;;  %s4200_s16 = scalar_lea.hbm %s4878_s11, 384 }
 0x4e1   : > { %p4197_p4 = scmp.ne.s32.totalorder %s4830_s15, %s4196_s24  ;;  %p4201_p9 = scmp.lt.s32.totalorder %s4830_s15, %s4878_s11 }
 0x4e2   : > { %p4202_p10 = scmp.lt.s32.totalorder %s4200_s16, %s4196_s24 }
 0x4e3   : > { %p4198_p7 = pnand %p4197_p4, %p4355_p5 }
 0x4e4   : > { %p4203_p11 = por %p4202_p10, %p4201_p9 }
 0x4e5   : > { %p4199_p8 = pneg %p4198_p7 }
 0x4e7   : > { %p4204_p12 = pnand %p4203_p11, %p4199_p8 }
 0x4e9   : > { %4207 = shalt.err (!%p4204_p12)
}
 0x4ea   : > { %4123 = dma.vmem_to_hbm [thread:$0]  (%p4355_p5), %s3823_s29, 192, %s4830_s15, %s3808_s13  }
 0x4eb PF: > { %p4129_p13 = scmp.ge.s32.totalorder %s4242_s20, 2  ;;  %s3834_s0 = sand.u32 1, %s4230_s17  }
 0x4ec   : > { %s3835_s14 = scalar_lea.sflag [#allocation5], %s3834_s0 }
 0x4ed   : > { %p4126_p0 = pnand %p4129_p13, %p4359_p6 }
 0x4ef   : > { %p4127_p1 = pneg %p4126_p0 }
 0x4f1   : > { %4225 = dma.done.wait (%p4127_p1), %s3835_s14, 192  }
 0x4f2   : > { %4227 = vsyncadd (%p4127_p1), %s3835_s14, 4294967104  ;;  %p21_p2 = scmp.ge.s32.totalorder %s4342_s23, 4   ;;  %s4892_s17 = smov %s4234_s18 }
 0x4f3   : > { %s4893_s18 = smov %s4238_s19  ;;  %s4894_s19 = smov %s4353_s26 }
 0x4f4   : > { %s4895_s20 = smov %s4342_s23  ;;  %23 = sbr.rel (!%p21_p2) target bundleno = 5 (0x5), region = 118 }
 0x4f9   :  { %3840 = vsyncpa [#allocation5], 1 }
 0x4fa   :  { %3842 = vsyncpa [#allocation5 + $0x1], 1 }

</bundles_post_ra>
